<compile_context>
chip_gen: v5e
topology: v5e:2x2
jax: 0.10.0
libtpu: 0.0.40
codegen_flags: <defaults>
</compile_context>

<pallas_src>
import functools
import math

import jax
import jax.numpy as jnp
from jax import lax
from jax.experimental import pallas as pl
from jax.experimental.pallas import tpu as pltpu


# --------------------------- input projection -------------------------------

def _input_proj_kernel(x_ref, w_ref, b_ref, pre_ref):
    pre_ref[...] = (
        jnp.dot(x_ref[...], w_ref[...], preferred_element_type=jnp.float32)
        + b_ref[...]
    ).astype(pre_ref.dtype)


def _pick_row_tile(rows, max_tile=512):
    if rows <= max_tile:
        return rows
    for t in range(max_tile, 0, -1):
        if rows % t == 0 and t % 8 == 0:
            return t
    return rows


def _pick_col_tile(g, max_tile=2048):
    if g <= max_tile:
        return g
    for t in range(max_tile, 0, -128):
        if t % 128 == 0 and g % t == 0:
            return t
    return g


def input_projection(x2d, w_cat, b_cat):
    """x2d: (T*B, E); w_cat: (E, 8H) fwd|bwd concatenated; b_cat: (1, 8H)."""
    rows, e = x2d.shape
    g = w_cat.shape[1]
    tm = _pick_row_tile(rows)
    tn = _pick_col_tile(g)
    return pl.pallas_call(
        _input_proj_kernel,
        out_shape=jax.ShapeDtypeStruct((rows, g), jnp.float32),
        grid_spec=pltpu.PrefetchScalarGridSpec(
            num_scalar_prefetch=0,
            grid=(rows // tm, g // tn),
            in_specs=[
                pl.BlockSpec((tm, e), lambda i, j: (i, 0)),
                pl.BlockSpec((e, tn), lambda i, j: (0, j)),
                pl.BlockSpec((1, tn), lambda i, j: (0, j)),
            ],
            out_specs=pl.BlockSpec((tm, tn), lambda i, j: (i, j)),
        ),
        compiler_params=pltpu.CompilerParams(
            dimension_semantics=("parallel", "parallel")),
    )(x2d, w_cat, b_cat)


# ----------------------- fused bidirectional recurrence ---------------------

def _bilstm_chunk_kernel(pre_ref, whh_ref, out_ref, cN_ref, h_scr, c_scr,
                         *, hidden, tc):
    """One grid step == one direction x one chunk of tc time steps."""
    d = pl.program_id(0)            # 0 = forward, 1 = backward direction
    c = pl.program_id(1)            # time-chunk index (sequential recurrence)
    n_chunks = pl.num_programs(1)

    @pl.when(c == 0)
    def _():
        h_scr[...] = jnp.zeros_like(h_scr)
        c_scr[...] = jnp.zeros_like(c_scr)

    whh = whh_ref[...]              # (H, 4H), resident across the whole grid

    def step(i, carry):
        h, cell = carry
        # forward walks the chunk 0..tc-1; backward walks tc-1..0
        t_loc = i + d * (tc - 1 - 2 * i)
        gates = pre_ref[t_loc] + jnp.dot(h.astype(whh.dtype), whh,
                                         preferred_element_type=jnp.float32)
        # PyTorch gate order [i, f, g, o].  With hidden a multiple of 128 these
        # slices are full vregs; at hidden=32 they are lane sub-slices (cheap
        # selects, minor at this size).
        i_g = jax.nn.sigmoid(gates[:, 0 * hidden:1 * hidden])
        f_g = jax.nn.sigmoid(gates[:, 1 * hidden:2 * hidden])
        g_g = jnp.tanh(gates[:, 2 * hidden:3 * hidden])
        o_g = jax.nn.sigmoid(gates[:, 3 * hidden:4 * hidden])
        c_new = f_g * cell + i_g * g_g
        h_new = o_g * jnp.tanh(c_new)
        out_ref[t_loc] = h_new.astype(out_ref.dtype)
        return h_new, c_new

    h_fin, c_fin = lax.fori_loop(0, tc, step, (h_scr[...], c_scr[...]),
                                 unroll=True)
    h_scr[...] = h_fin
    c_scr[...] = c_fin

    # Final cell state for this direction: only write on the last chunk (the
    # output block is resident across the chunk axis, DMA'd once per direction).
    @pl.when(c == n_chunks - 1)
    def _():
        cN_ref[...] = c_fin.astype(cN_ref.dtype)


def _pick_time_chunk(t, b, hidden, max_chunk=16, vmem_budget=8 << 20):
    # pre chunk row (B, 8H halved per direction -> 4H) + out chunk row (B, H),
    # f32, double-buffered by the auto-pipeline.
    per_step = (4 * hidden + hidden) * b * 4
    cap = max(1, vmem_budget // (2 * max(per_step, 1)))
    limit = max(1, min(t, max_chunk, cap))
    for tc in range(limit, 0, -1):
        if t % tc == 0:
            return tc
    return 1


def bilstm_recurrence(pre, whh_stack, hidden):
    """pre: (T, B, 8H) fwd|bwd pre-activations; whh_stack: (2, H, 4H)."""
    T, B, g2 = pre.shape
    assert g2 == 8 * hidden
    tc = _pick_time_chunk(T, B, hidden)
    n_chunks = T // tc
    kernel = functools.partial(_bilstm_chunk_kernel, hidden=hidden, tc=tc)

    def pre_map(d, c):
        # forward: chunk c; backward: chunk n_chunks-1-c.  Last-dim block d
        # selects this direction's 4H slab of the fused pre-activation.
        return (c + d * (n_chunks - 1 - 2 * c), 0, d)

    def out_map(d, c):
        return (d, c + d * (n_chunks - 1 - 2 * c), 0, 0)

    out, c_n = pl.pallas_call(
        kernel,
        out_shape=(
            jax.ShapeDtypeStruct((2, T, B, hidden), jnp.float32),
            jax.ShapeDtypeStruct((2, B, hidden), jnp.float32),
        ),
        grid_spec=pltpu.PrefetchScalarGridSpec(
            num_scalar_prefetch=0,
            grid=(2, n_chunks),
            in_specs=[
                pl.BlockSpec((tc, B, 4 * hidden), pre_map),
                pl.BlockSpec((pl.Squeezed(), hidden, 4 * hidden),
                             lambda d, c: (d, 0, 0)),
            ],
            out_specs=(
                pl.BlockSpec((pl.Squeezed(), tc, B, hidden), out_map),
                pl.BlockSpec((pl.Squeezed(), B, hidden),
                             lambda d, c: (d, 0, 0)),
            ),
            scratch_shapes=[
                pltpu.VMEM((B, hidden), jnp.float32),   # h carry
                pltpu.VMEM((B, hidden), jnp.float32),   # c carry
            ],
        ),
        compiler_params=pltpu.CompilerParams(
            # Direction axis is independent (can split across TensorCores on
            # v7x); the chunk axis carries the recurrence -> sequential.
            dimension_semantics=("parallel", "arbitrary")),
    )(pre, whh_stack)
    return out, c_n


# ------------------------------ parameter init ------------------------------

def _xavier_uniform(key, shape, gain=1.0):
    fan_out, fan_in = shape
    limit = gain * math.sqrt(6.0 / (fan_in + fan_out))
    return jax.random.uniform(key, shape, jnp.float32, -limit, limit)


def init_params(key, n_words, emb_dim, hidden, form_padding_idx=1,
                forget_bias=1.0):
    keys = jax.random.split(key, 5)
    # nn.Embedding default: N(0, 1), padding row zeroed.
    emb = jax.random.normal(keys[0], (n_words, emb_dim), jnp.float32)
    emb = emb.at[form_padding_idx].set(0.0)

    def _dir(k_ih, k_hh):
        w_ih = _xavier_uniform(k_ih, (4 * hidden, emb_dim))   # (4H, E)
        w_hh = _xavier_uniform(k_hh, (4 * hidden, hidden))    # (4H, H)
        b_ih = jnp.zeros((4 * hidden,), jnp.float32).at[hidden:2 * hidden].set(forget_bias)
        b_hh = jnp.zeros((4 * hidden,), jnp.float32).at[hidden:2 * hidden].set(forget_bias)
        return w_ih.T, w_hh.T, (b_ih + b_hh)

    w_ih_f, w_hh_f, b_f = _dir(keys[1], keys[2])
    w_ih_b, w_hh_b, b_b = _dir(keys[3], keys[4])
    return {
        "embedding": emb,
        # fused input-projection weights / folded bias: (E, 8H), (1, 8H)
        "w_ih_cat": jnp.concatenate([w_ih_f, w_ih_b], axis=1),
        "b_cat": jnp.concatenate([b_f, b_b]).reshape(1, 8 * hidden),
        # recurrent weights stacked on a direction axis: (2, H, 4H)
        "w_hh_stack": jnp.stack([w_hh_f, w_hh_b], axis=0),
    }


# ------------------------------ forward pass --------------------------------

def recurrent_encoder_forward(params, form_var, hidden,
                              matmul_dtype=jnp.float32):
    """Mirrors RecurrentEncoder.forward (eval-mode dropout, full-length seqs)."""
    # embedding lookup (XLA glue gather); emb_dropout is identity in eval mode
    embedded = jnp.take(params["embedding"], form_var, axis=0)      # (B, T, E)
    x = jnp.transpose(embedded, (1, 0, 2)).astype(jnp.float32)      # (T, B, E)
    T, B, E = x.shape

    # (1) hoisted input projection: ONE matmul for both directions, bias folded
    w_cat = params["w_ih_cat"].astype(matmul_dtype)
    pre2d = input_projection(x.reshape(T * B, E).astype(matmul_dtype),
                             w_cat, params["b_cat"])                # (T*B, 8H)
    pre = pre2d.reshape(T, B, 8 * hidden)

    # (2) fused bidirectional recurrence (serial part only)
    whh = params["w_hh_stack"].astype(matmul_dtype)                 # (2, H, 4H)
    out, c_n = bilstm_recurrence(pre, whh, hidden)   # (2,T,B,H), (2,B,H)

    output = jnp.concatenate([out[0], out[1]], axis=-1)             # (T, B, 2H)
    output = jnp.transpose(output, (1, 0, 2))                       # (B, T, 2H)
    # h_n: forward = state after t=T-1; backward = state after t=0.
    h_n = jnp.stack([out[0, -1], out[1, 0]], axis=0)                # (2, B, H)
    return output, (h_n, c_n)


# --------------------------- pure-JAX reference -----------------------------

def _reference_forward(params, form_var, hidden):
    embedded = jnp.take(params["embedding"], form_var, axis=0)
    x = jnp.transpose(embedded, (1, 0, 2)).astype(jnp.float32)      # (T, B, E)
    T, B, _ = x.shape
    h4 = 4 * hidden
    w_ih = (params["w_ih_cat"][:, :h4], params["w_ih_cat"][:, h4:])
    b = (params["b_cat"][0, :h4], params["b_cat"][0, h4:])
    w_hh = (params["w_hh_stack"][0], params["w_hh_stack"][1])

    def run(direction):
        xs = x[::-1] if direction == 1 else x

        def step(carry, xt):
            h, c = carry
            gates = xt @ w_ih[direction] + h @ w_hh[direction] + b[direction]
            i_g = jax.nn.sigmoid(gates[:, :hidden])
            f_g = jax.nn.sigmoid(gates[:, hidden:2 * hidden])
            g_g = jnp.tanh(gates[:, 2 * hidden:3 * hidden])
            o_g = jax.nn.sigmoid(gates[:, 3 * hidden:])
            c = f_g * c + i_g * g_g
            h = o_g * jnp.tanh(c)
            return (h, c), h

        init = (jnp.zeros((B, hidden), jnp.float32),
                jnp.zeros((B, hidden), jnp.float32))
        (h_fin, c_fin), ys = lax.scan(step, init, xs)
        ys = ys[::-1] if direction == 1 else ys
        return ys, h_fin, c_fin

    yf, hf, cf = run(0)
    yb, hb, cb = run(1)
    output = jnp.transpose(jnp.concatenate([yf, yb], axis=-1), (1, 0, 2))
    return output, (jnp.stack([hf, hb]), jnp.stack([cf, cb]))


if __name__ == "__main__":
    B, T = 2, 8
    n_words = 50
    emb_dim = 32
    hidden = 32          # self.dim
    form_padding_idx = 1

    key = jax.random.PRNGKey(0)
    k_params, k_tokens = jax.random.split(key)
    params = init_params(k_params, n_words, emb_dim, hidden, form_padding_idx)
    form_var = jax.random.randint(k_tokens, (B, T), 0, n_words, dtype=jnp.int32)

    fwd = jax.jit(functools.partial(recurrent_encoder_forward, hidden=hidden))
    output, (h_n, c_n) = fwd(params, form_var)
    jax.block_until_ready((output, h_n, c_n))

    assert output.shape == (B, T, 2 * hidden)
    assert h_n.shape == (2, B, hidden) and c_n.shape == (2, B, hidden)

    # Sanity check against a pure-JAX lax.scan reference.  Loose tolerance only
    # because TPU default matmul precision may differ between the XLA dots and
    # the MXU dots; genuine indexing/reversal bugs produce O(0.1..1) diffs.
    ref_out, (ref_h, ref_c) = jax.jit(
        functools.partial(_reference_forward, hidden=hidden))(params, form_var)
    assert jnp.allclose(output, ref_out, atol=2e-2, rtol=2e-2)
    assert jnp.allclose(h_n, ref_h, atol=2e-2, rtol=2e-2)
    assert jnp.allclose(c_n, ref_c, atol=2e-2, rtol=2e-2)

    print("KERNEL_OK")
</pallas_src>

<mosaic_0001>
module attributes {stable_mosaic.version = 11 : i64} {
  func.func @_input_proj_kernel(%arg0: i32, %arg1: i32, %arg2: memref<16x32xf32, #tpu.memory_space<vmem>>, %arg3: memref<32x256xf32, #tpu.memory_space<vmem>>, %arg4: memref<1x256xf32, #tpu.memory_space<vmem>>, %arg5: memref<16x256xf32, #tpu.memory_space<vmem>>) attributes {dimension_semantics = [#tpu.dimension_semantics<parallel>, #tpu.dimension_semantics<parallel>], iteration_bounds = array<i64: 1, 1>, scalar_prefetch = 0 : i64, scratch_operands = 0 : i64, tpu.core_type = #tpu.core_type<tc>, window_params = [{transform_indices = @transform_0, window_bounds = array<i64: 16, 32>}, {transform_indices = @transform_1, window_bounds = array<i64: 32, 256>}, {transform_indices = @transform_2, window_bounds = array<i64: 1, 256>}, {transform_indices = @transform_3, window_bounds = array<i64: 16, 256>}]} {
    %c0 = arith.constant 0 : index
    %c0_0 = arith.constant 0 : index
    %0 = vector.load %arg2[%c0, %c0_0] : memref<16x32xf32, #tpu.memory_space<vmem>>, vector<16x32xf32>
    %c0_1 = arith.constant 0 : index
    %c0_2 = arith.constant 0 : index
    %1 = vector.load %arg3[%c0_1, %c0_2] : memref<32x256xf32, #tpu.memory_space<vmem>>, vector<32x256xf32>
    %cst = arith.constant dense<0.000000e+00> : vector<16x256xf32>
    %2 = tpu.matmul %0, %1, %cst {dimension_numbers = #tpu.dot_dimension_numbers<[1], [0], [0], [1], [0, 0, 1, 1], [], []>} : vector<16x32xf32>, vector<32x256xf32>, vector<16x256xf32> -> vector<16x256xf32>
    %c0_3 = arith.constant 0 : index
    %c0_4 = arith.constant 0 : index
    %3 = vector.load %arg4[%c0_3, %c0_4] : memref<1x256xf32, #tpu.memory_space<vmem>>, vector<1x256xf32>
    %4 = vector.broadcast %3 : vector<1x256xf32> to vector<16x256xf32>
    %5 = arith.addf %2, %4 : vector<16x256xf32>
    %c0_5 = arith.constant 0 : index
    %c0_6 = arith.constant 0 : index
    %6 = vector.load %arg5[%c0_5, %c0_6] : memref<16x256xf32, #tpu.memory_space<vmem>>, vector<16x256xf32>
    tpu.vector_store %arg5[%c0_5, %c0_6], %5 {strides = array<i32>} : memref<16x256xf32, #tpu.memory_space<vmem>>, vector<16x256xf32>,
    return
  }
  func.func @transform_0(%arg0: i32, %arg1: i32) -> (i32, i32) {
    %c0_i32 = arith.constant 0 : i32
    %c0_i32_0 = arith.constant 0 : i32
    return %arg0, %c0_i32 : i32, i32
  }
  func.func @transform_1(%arg0: i32, %arg1: i32) -> (i32, i32) {
    %c0_i32 = arith.constant 0 : i32
    %c0_i32_0 = arith.constant 0 : i32
    return %c0_i32, %arg1 : i32, i32
  }
  func.func @transform_2(%arg0: i32, %arg1: i32) -> (i32, i32) {
    %c0_i32 = arith.constant 0 : i32
    %c0_i32_0 = arith.constant 0 : i32
    return %c0_i32, %arg1 : i32, i32
  }
  func.func @transform_3(%arg0: i32, %arg1: i32) -> (i32, i32) {
    %c0_i32 = arith.constant 0 : i32
    return %arg0, %arg1 : i32, i32
  }
}

module attributes {stable_mosaic.version = 11 : i64} {
  func.func @_bilstm_chunk_kernel(%arg0: i32, %arg1: i32, %arg2: memref<8x2x128xf32, #tpu.memory_space<vmem>>, %arg3: memref<1x32x128xf32, #tpu.memory_space<vmem>>, %arg4: memref<1x8x2x32xf32, #tpu.memory_space<vmem>>, %arg5: memref<1x2x32xf32, #tpu.memory_space<vmem>>, %arg6: memref<2x32xf32, #tpu.memory_space<vmem>>, %arg7: memref<2x32xf32, #tpu.memory_space<vmem>>) attributes {dimension_semantics = [#tpu.dimension_semantics<parallel>, #tpu.dimension_semantics<arbitrary>], iteration_bounds = array<i64: 2, 1>, scalar_prefetch = 0 : i64, scratch_operands = 2 : i64, tpu.core_type = #tpu.core_type<tc>, window_params = [{transform_indices = @transform_0, window_bounds = array<i64: 8, 2, 128>}, {transform_indices = @transform_1, window_bounds = array<i64: 1, 32, 128>}, {transform_indices = @transform_2, window_bounds = array<i64: 1, 8, 2, 32>}, {transform_indices = @transform_3, window_bounds = array<i64: 1, 2, 32>}]} {
    %c0_i32 = arith.constant 0 : i32
    %0 = arith.cmpi eq, %arg1, %c0_i32 : i32
    %1 = arith.extui %0 : i1 to i32
    %c0_i32_0 = arith.constant 0 : i32
    %2 = arith.cmpi ne, %1, %c0_i32_0 : i32
    scf.if %2 {
      %cst_101 = arith.constant 0.000000e+00 : f32
      %316 = vector.broadcast %cst_101 : f32 to vector<2x32xf32>
      %c0_102 = arith.constant 0 : index
      %c0_103 = arith.constant 0 : index
      %317 = vector.load %arg6[%c0_102, %c0_103] : memref<2x32xf32, #tpu.memory_space<vmem>>, vector<2x32xf32>
      tpu.vector_store %arg6[%c0_102, %c0_103], %316 {strides = array<i32>} : memref<2x32xf32, #tpu.memory_space<vmem>>, vector<2x32xf32>,
      %cst_104 = arith.constant 0.000000e+00 : f32
      %318 = vector.broadcast %cst_104 : f32 to vector<2x32xf32>
      %c0_105 = arith.constant 0 : index
      %c0_106 = arith.constant 0 : index
      %319 = vector.load %arg7[%c0_105, %c0_106] : memref<2x32xf32, #tpu.memory_space<vmem>>, vector<2x32xf32>
      tpu.vector_store %arg7[%c0_105, %c0_106], %318 {strides = array<i32>} : memref<2x32xf32, #tpu.memory_space<vmem>>, vector<2x32xf32>,
    } else {
    }
    %c0 = arith.constant 0 : index
    %c0_1 = arith.constant 0 : index
    %c0_2 = arith.constant 0 : index
    %3 = vector.load %arg3[%c0, %c0_1, %c0_2] : memref<1x32x128xf32, #tpu.memory_space<vmem>>, vector<1x32x128xf32>
    %4 = vector.shape_cast %3 : vector<1x32x128xf32> to vector<32x128xf32>
    %c0_3 = arith.constant 0 : index
    %c0_4 = arith.constant 0 : index
    %5 = vector.load %arg6[%c0_3, %c0_4] : memref<2x32xf32, #tpu.memory_space<vmem>>, vector<2x32xf32>
    %c0_5 = arith.constant 0 : index
    %c0_6 = arith.constant 0 : index
    %6 = vector.load %arg7[%c0_5, %c0_6] : memref<2x32xf32, #tpu.memory_space<vmem>>, vector<2x32xf32>
    %c0_i32_7 = arith.constant 0 : i32
    %c2_i32 = arith.constant 2 : i32
    %7 = arith.muli %c2_i32, %c0_i32_7 : i32
    %c7_i32 = arith.constant 7 : i32
    %8 = arith.subi %c7_i32, %7 : i32
    %9 = arith.muli %arg0, %8 : i32
    %10 = arith.addi %c0_i32_7, %9 : i32
    %11 = arith.index_cast %10 : i32 to index
    %c0_8 = arith.constant 0 : index
    %c0_9 = arith.constant 0 : index
    %12 = vector.load %arg2[%11, %c0_8, %c0_9] : memref<8x2x128xf32, #tpu.memory_space<vmem>>, vector<1x2x128xf32>
    %13 = vector.shape_cast %12 : vector<1x2x128xf32> to vector<2x128xf32>
    %cst = arith.constant dense<0.000000e+00> : vector<2x128xf32>
    %14 = tpu.matmul %5, %4, %cst {dimension_numbers = #tpu.dot_dimension_numbers<[1], [0], [0], [1], [0, 0, 1, 1], [], []>} : vector<2x32xf32>, vector<32x128xf32>, vector<2x128xf32> -> vector<2x128xf32>
    %15 = arith.addf %13, %14 : vector<2x128xf32>
    %16 = vector.extract_strided_slice %15 {offsets = [0, 0], sizes = [2, 32], strides = [1, 1]} : vector<2x128xf32> to vector<2x32xf32>
    %17 = arith.negf %16 : vector<2x32xf32>
    %18 = math.exp %17 : vector<2x32xf32>
    %cst_10 = arith.constant 1.000000e+00 : f32
    %19 = vector.broadcast %cst_10 : f32 to vector<2x32xf32>
    %20 = arith.addf %19, %18 : vector<2x32xf32>
    %21 = arith.divf %19, %20 : vector<2x32xf32>
    %22 = vector.extract_strided_slice %15 {offsets = [0, 32], sizes = [2, 32], strides = [1, 1]} : vector<2x128xf32> to vector<2x32xf32>
    %23 = arith.negf %22 : vector<2x32xf32>
    %24 = math.exp %23 : vector<2x32xf32>
    %cst_11 = arith.constant 1.000000e+00 : f32
    %25 = vector.broadcast %cst_11 : f32 to vector<2x32xf32>
    %26 = arith.addf %25, %24 : vector<2x32xf32>
    %27 = arith.divf %25, %26 : vector<2x32xf32>
    %28 = vector.extract_strided_slice %15 {offsets = [0, 64], sizes = [2, 32], strides = [1, 1]} : vector<2x128xf32> to vector<2x32xf32>
    %29 = math.tanh %28 : vector<2x32xf32>
    %30 = vector.extract_strided_slice %15 {offsets = [0, 96], sizes = [2, 32], strides = [1, 1]} : vector<2x128xf32> to vector<2x32xf32>
    %31 = arith.negf %30 : vector<2x32xf32>
    %32 = math.exp %31 : vector<2x32xf32>
    %cst_12 = arith.constant 1.000000e+00 : f32
    %33 = vector.broadcast %cst_12 : f32 to vector<2x32xf32>
    %34 = arith.addf %33, %32 : vector<2x32xf32>
    %35 = arith.divf %33, %34 : vector<2x32xf32>
    %36 = arith.mulf %27, %6 : vector<2x32xf32>
    %37 = arith.mulf %21, %29 : vector<2x32xf32>
    %38 = arith.addf %36, %37 : vector<2x32xf32>
    %39 = math.tanh %38 : vector<2x32xf32>
    %40 = arith.mulf %35, %39 : vector<2x32xf32>
    %c0_13 = arith.constant 0 : index
    %41 = arith.index_cast %10 : i32 to index
    %c0_14 = arith.constant 0 : index
    %c0_15 = arith.constant 0 : index
    %42 = vector.load %arg4[%c0_13, %41, %c0_14, %c0_15] : memref<1x8x2x32xf32, #tpu.memory_space<vmem>>, vector<1x1x2x32xf32>
    %43 = vector.shape_cast %42 : vector<1x1x2x32xf32> to vector<2x32xf32>
    %44 = vector.shape_cast %40 : vector<2x32xf32> to vector<1x1x2x32xf32>
    tpu.vector_store %arg4[%c0_13, %41, %c0_14, %c0_15], %44 {strides = array<i32>} : memref<1x8x2x32xf32, #tpu.memory_space<vmem>>, vector<1x1x2x32xf32>,
    %c1_i32 = arith.constant 1 : i32
    %c2_i32_16 = arith.constant 2 : i32
    %45 = arith.muli %c2_i32_16, %c1_i32 : i32
    %c7_i32_17 = arith.constant 7 : i32
    %46 = arith.subi %c7_i32_17, %45 : i32
    %47 = arith.muli %arg0, %46 : i32
    %48 = arith.addi %c1_i32, %47 : i32
    %49 = arith.index_cast %48 : i32 to index
    %c0_18 = arith.constant 0 : index
    %c0_19 = arith.constant 0 : index
    %50 = vector.load %arg2[%49, %c0_18, %c0_19] : memref<8x2x128xf32, #tpu.memory_space<vmem>>, vector<1x2x128xf32>
    %51 = vector.shape_cast %50 : vector<1x2x128xf32> to vector<2x128xf32>
    %cst_20 = arith.constant dense<0.000000e+00> : vector<2x128xf32>
    %52 = tpu.matmul %40, %4, %cst_20 {dimension_numbers = #tpu.dot_dimension_numbers<[1], [0], [0], [1], [0, 0, 1, 1], [], []>} : vector<2x32xf32>, vector<32x128xf32>, vector<2x128xf32> -> vector<2x128xf32>
    %53 = arith.addf %51, %52 : vector<2x128xf32>
    %54 = vector.extract_strided_slice %53 {offsets = [0, 0], sizes = [2, 32], strides = [1, 1]} : vector<2x128xf32> to vector<2x32xf32>
    %55 = arith.negf %54 : vector<2x32xf32>
    %56 = math.exp %55 : vector<2x32xf32>
    %cst_21 = arith.constant 1.000000e+00 : f32
    %57 = vector.broadcast %cst_21 : f32 to vector<2x32xf32>
    %58 = arith.addf %57, %56 : vector<2x32xf32>
    %59 = arith.divf %57, %58 : vector<2x32xf32>
    %60 = vector.extract_strided_slice %53 {offsets = [0, 32], sizes = [2, 32], strides = [1, 1]} : vector<2x128xf32> to vector<2x32xf32>
    %61 = arith.negf %60 : vector<2x32xf32>
    %62 = math.exp %61 : vector<2x32xf32>
    %cst_22 = arith.constant 1.000000e+00 : f32
    %63 = vector.broadcast %cst_22 : f32 to vector<2x32xf32>
    %64 = arith.addf %63, %62 : vector<2x32xf32>
    %65 = arith.divf %63, %64 : vector<2x32xf32>
    %66 = vector.extract_strided_slice %53 {offsets = [0, 64], sizes = [2, 32], strides = [1, 1]} : vector<2x128xf32> to vector<2x32xf32>
    %67 = math.tanh %66 : vector<2x32xf32>
    %68 = vector.extract_strided_slice %53 {offsets = [0, 96], sizes = [2, 32], strides = [1, 1]} : vector<2x128xf32> to vector<2x32xf32>
    %69 = arith.negf %68 : vector<2x32xf32>
    %70 = math.exp %69 : vector<2x32xf32>
    %cst_23 = arith.constant 1.000000e+00 : f32
    %71 = vector.broadcast %cst_23 : f32 to vector<2x32xf32>
    %72 = arith.addf %71, %70 : vector<2x32xf32>
    %73 = arith.divf %71, %72 : vector<2x32xf32>
    %74 = arith.mulf %65, %38 : vector<2x32xf32>
    %75 = arith.mulf %59, %67 : vector<2x32xf32>
    %76 = arith.addf %74, %75 : vector<2x32xf32>
    %77 = math.tanh %76 : vector<2x32xf32>
    %78 = arith.mulf %73, %77 : vector<2x32xf32>
    %c0_24 = arith.constant 0 : index
    %79 = arith.index_cast %48 : i32 to index
    %c0_25 = arith.constant 0 : index
    %c0_26 = arith.constant 0 : index
    %80 = vector.load %arg4[%c0_24, %79, %c0_25, %c0_26] : memref<1x8x2x32xf32, #tpu.memory_space<vmem>>, vector<1x1x2x32xf32>
    %81 = vector.shape_cast %80 : vector<1x1x2x32xf32> to vector<2x32xf32>
    %82 = vector.shape_cast %78 : vector<2x32xf32> to vector<1x1x2x32xf32>
    tpu.vector_store %arg4[%c0_24, %79, %c0_25, %c0_26], %82 {strides = array<i32>} : memref<1x8x2x32xf32, #tpu.memory_space<vmem>>, vector<1x1x2x32xf32>,
    %c2_i32_27 = arith.constant 2 : i32
    %c2_i32_28 = arith.constant 2 : i32
    %83 = arith.muli %c2_i32_28, %c2_i32_27 : i32
    %c7_i32_29 = arith.constant 7 : i32
    %84 = arith.subi %c7_i32_29, %83 : i32
    %85 = arith.muli %arg0, %84 : i32
    %86 = arith.addi %c2_i32_27, %85 : i32
    %87 = arith.index_cast %86 : i32 to index
    %c0_30 = arith.constant 0 : index
    %c0_31 = arith.constant 0 : index
    %88 = vector.load %arg2[%87, %c0_30, %c0_31] : memref<8x2x128xf32, #tpu.memory_space<vmem>>, vector<1x2x128xf32>
    %89 = vector.shape_cast %88 : vector<1x2x128xf32> to vector<2x128xf32>
    %cst_32 = arith.constant dense<0.000000e+00> : vector<2x128xf32>
    %90 = tpu.matmul %78, %4, %cst_32 {dimension_numbers = #tpu.dot_dimension_numbers<[1], [0], [0], [1], [0, 0, 1, 1], [], []>} : vector<2x32xf32>, vector<32x128xf32>, vector<2x128xf32> -> vector<2x128xf32>
    %91 = arith.addf %89, %90 : vector<2x128xf32>
    %92 = vector.extract_strided_slice %91 {offsets = [0, 0], sizes = [2, 32], strides = [1, 1]} : vector<2x128xf32> to vector<2x32xf32>
    %93 = arith.negf %92 : vector<2x32xf32>
    %94 = math.exp %93 : vector<2x32xf32>
    %cst_33 = arith.constant 1.000000e+00 : f32
    %95 = vector.broadcast %cst_33 : f32 to vector<2x32xf32>
    %96 = arith.addf %95, %94 : vector<2x32xf32>
    %97 = arith.divf %95, %96 : vector<2x32xf32>
    %98 = vector.extract_strided_slice %91 {offsets = [0, 32], sizes = [2, 32], strides = [1, 1]} : vector<2x128xf32> to vector<2x32xf32>
    %99 = arith.negf %98 : vector<2x32xf32>
    %100 = math.exp %99 : vector<2x32xf32>
    %cst_34 = arith.constant 1.000000e+00 : f32
    %101 = vector.broadcast %cst_34 : f32 to vector<2x32xf32>
    %102 = arith.addf %101, %100 : vector<2x32xf32>
    %103 = arith.divf %101, %102 : vector<2x32xf32>
    %104 = vector.extract_strided_slice %91 {offsets = [0, 64], sizes = [2, 32], strides = [1, 1]} : vector<2x128xf32> to vector<2x32xf32>
    %105 = math.tanh %104 : vector<2x32xf32>
    %106 = vector.extract_strided_slice %91 {offsets = [0, 96], sizes = [2, 32], strides = [1, 1]} : vector<2x128xf32> to vector<2x32xf32>
    %107 = arith.negf %106 : vector<2x32xf32>
    %108 = math.exp %107 : vector<2x32xf32>
    %cst_35 = arith.constant 1.000000e+00 : f32
    %109 = vector.broadcast %cst_35 : f32 to vector<2x32xf32>
    %110 = arith.addf %109, %108 : vector<2x32xf32>
    %111 = arith.divf %109, %110 : vector<2x32xf32>
    %112 = arith.mulf %103, %76 : vector<2x32xf32>
    %113 = arith.mulf %97, %105 : vector<2x32xf32>
    %114 = arith.addf %112, %113 : vector<2x32xf32>
    %115 = math.tanh %114 : vector<2x32xf32>
    %116 = arith.mulf %111, %115 : vector<2x32xf32>
    %c0_36 = arith.constant 0 : index
    %117 = arith.index_cast %86 : i32 to index
    %c0_37 = arith.constant 0 : index
    %c0_38 = arith.constant 0 : index
    %118 = vector.load %arg4[%c0_36, %117, %c0_37, %c0_38] : memref<1x8x2x32xf32, #tpu.memory_space<vmem>>, vector<1x1x2x32xf32>
    %119 = vector.shape_cast %118 : vector<1x1x2x32xf32> to vector<2x32xf32>
    %120 = vector.shape_cast %116 : vector<2x32xf32> to vector<1x1x2x32xf32>
    tpu.vector_store %arg4[%c0_36, %117, %c0_37, %c0_38], %120 {strides = array<i32>} : memref<1x8x2x32xf32, #tpu.memory_space<vmem>>, vector<1x1x2x32xf32>,
    %c3_i32 = arith.constant 3 : i32
    %c2_i32_39 = arith.constant 2 : i32
    %121 = arith.muli %c2_i32_39, %c3_i32 : i32
    %c7_i32_40 = arith.constant 7 : i32
    %122 = arith.subi %c7_i32_40, %121 : i32
    %123 = arith.muli %arg0, %122 : i32
    %124 = arith.addi %c3_i32, %123 : i32
    %125 = arith.index_cast %124 : i32 to index
    %c0_41 = arith.constant 0 : index
    %c0_42 = arith.constant 0 : index
    %126 = vector.load %arg2[%125, %c0_41, %c0_42] : memref<8x2x128xf32, #tpu.memory_space<vmem>>, vector<1x2x128xf32>
    %127 = vector.shape_cast %126 : vector<1x2x128xf32> to vector<2x128xf32>
    %cst_43 = arith.constant dense<0.000000e+00> : vector<2x128xf32>
    %128 = tpu.matmul %116, %4, %cst_43 {dimension_numbers = #tpu.dot_dimension_numbers<[1], [0], [0], [1], [0, 0, 1, 1], [], []>} : vector<2x32xf32>, vector<32x128xf32>, vector<2x128xf32> -> vector<2x128xf32>
    %129 = arith.addf %127, %128 : vector<2x128xf32>
    %130 = vector.extract_strided_slice %129 {offsets = [0, 0], sizes = [2, 32], strides = [1, 1]} : vector<2x128xf32> to vector<2x32xf32>
    %131 = arith.negf %130 : vector<2x32xf32>
    %132 = math.exp %131 : vector<2x32xf32>
    %cst_44 = arith.constant 1.000000e+00 : f32
    %133 = vector.broadcast %cst_44 : f32 to vector<2x32xf32>
    %134 = arith.addf %133, %132 : vector<2x32xf32>
    %135 = arith.divf %133, %134 : vector<2x32xf32>
    %136 = vector.extract_strided_slice %129 {offsets = [0, 32], sizes = [2, 32], strides = [1, 1]} : vector<2x128xf32> to vector<2x32xf32>
    %137 = arith.negf %136 : vector<2x32xf32>
    %138 = math.exp %137 : vector<2x32xf32>
    %cst_45 = arith.constant 1.000000e+00 : f32
    %139 = vector.broadcast %cst_45 : f32 to vector<2x32xf32>
    %140 = arith.addf %139, %138 : vector<2x32xf32>
    %141 = arith.divf %139, %140 : vector<2x32xf32>
    %142 = vector.extract_strided_slice %129 {offsets = [0, 64], sizes = [2, 32], strides = [1, 1]} : vector<2x128xf32> to vector<2x32xf32>
    %143 = math.tanh %142 : vector<2x32xf32>
    %144 = vector.extract_strided_slice %129 {offsets = [0, 96], sizes = [2, 32], strides = [1, 1]} : vector<2x128xf32> to vector<2x32xf32>
    %145 = arith.negf %144 : vector<2x32xf32>
    %146 = math.exp %145 : vector<2x32xf32>
    %cst_46 = arith.constant 1.000000e+00 : f32
    %147 = vector.broadcast %cst_46 : f32 to vector<2x32xf32>
    %148 = arith.addf %147, %146 : vector<2x32xf32>
    %149 = arith.divf %147, %148 : vector<2x32xf32>
    %150 = arith.mulf %141, %114 : vector<2x32xf32>
    %151 = arith.mulf %135, %143 : vector<2x32xf32>
    %152 = arith.addf %150, %151 : vector<2x32xf32>
    %153 = math.tanh %152 : vector<2x32xf32>
    %154 = arith.mulf %149, %153 : vector<2x32xf32>
    %c0_47 = arith.constant 0 : index
    %155 = arith.index_cast %124 : i32 to index
    %c0_48 = arith.constant 0 : index
    %c0_49 = arith.constant 0 : index
    %156 = vector.load %arg4[%c0_47, %155, %c0_48, %c0_49] : memref<1x8x2x32xf32, #tpu.memory_space<vmem>>, vector<1x1x2x32xf32>
    %157 = vector.shape_cast %156 : vector<1x1x2x32xf32> to vector<2x32xf32>
    %158 = vector.shape_cast %154 : vector<2x32xf32> to vector<1x1x2x32xf32>
    tpu.vector_store %arg4[%c0_47, %155, %c0_48, %c0_49], %158 {strides = array<i32>} : memref<1x8x2x32xf32, #tpu.memory_space<vmem>>, vector<1x1x2x32xf32>,
    %c4_i32 = arith.constant 4 : i32
    %c2_i32_50 = arith.constant 2 : i32
    %159 = arith.muli %c2_i32_50, %c4_i32 : i32
    %c7_i32_51 = arith.constant 7 : i32
    %160 = arith.subi %c7_i32_51, %159 : i32
    %161 = arith.muli %arg0, %160 : i32
    %162 = arith.addi %c4_i32, %161 : i32
    %163 = arith.index_cast %162 : i32 to index
    %c0_52 = arith.constant 0 : index
    %c0_53 = arith.constant 0 : index
    %164 = vector.load %arg2[%163, %c0_52, %c0_53] : memref<8x2x128xf32, #tpu.memory_space<vmem>>, vector<1x2x128xf32>
    %165 = vector.shape_cast %164 : vector<1x2x128xf32> to vector<2x128xf32>
    %cst_54 = arith.constant dense<0.000000e+00> : vector<2x128xf32>
    %166 = tpu.matmul %154, %4, %cst_54 {dimension_numbers = #tpu.dot_dimension_numbers<[1], [0], [0], [1], [0, 0, 1, 1], [], []>} : vector<2x32xf32>, vector<32x128xf32>, vector<2x128xf32> -> vector<2x128xf32>
    %167 = arith.addf %165, %166 : vector<2x128xf32>
    %168 = vector.extract_strided_slice %167 {offsets = [0, 0], sizes = [2, 32], strides = [1, 1]} : vector<2x128xf32> to vector<2x32xf32>
    %169 = arith.negf %168 : vector<2x32xf32>
    %170 = math.exp %169 : vector<2x32xf32>
    %cst_55 = arith.constant 1.000000e+00 : f32
    %171 = vector.broadcast %cst_55 : f32 to vector<2x32xf32>
    %172 = arith.addf %171, %170 : vector<2x32xf32>
    %173 = arith.divf %171, %172 : vector<2x32xf32>
    %174 = vector.extract_strided_slice %167 {offsets = [0, 32], sizes = [2, 32], strides = [1, 1]} : vector<2x128xf32> to vector<2x32xf32>
    %175 = arith.negf %174 : vector<2x32xf32>
    %176 = math.exp %175 : vector<2x32xf32>
    %cst_56 = arith.constant 1.000000e+00 : f32
    %177 = vector.broadcast %cst_56 : f32 to vector<2x32xf32>
    %178 = arith.addf %177, %176 : vector<2x32xf32>
    %179 = arith.divf %177, %178 : vector<2x32xf32>
    %180 = vector.extract_strided_slice %167 {offsets = [0, 64], sizes = [2, 32], strides = [1, 1]} : vector<2x128xf32> to vector<2x32xf32>
    %181 = math.tanh %180 : vector<2x32xf32>
    %182 = vector.extract_strided_slice %167 {offsets = [0, 96], sizes = [2, 32], strides = [1, 1]} : vector<2x128xf32> to vector<2x32xf32>
    %183 = arith.negf %182 : vector<2x32xf32>
    %184 = math.exp %183 : vector<2x32xf32>
    %cst_57 = arith.constant 1.000000e+00 : f32
    %185 = vector.broadcast %cst_57 : f32 to vector<2x32xf32>
    %186 = arith.addf %185, %184 : vector<2x32xf32>
    %187 = arith.divf %185, %186 : vector<2x32xf32>
    %188 = arith.mulf %179, %152 : vector<2x32xf32>
    %189 = arith.mulf %173, %181 : vector<2x32xf32>
    %190 = arith.addf %188, %189 : vector<2x32xf32>
    %191 = math.tanh %190 : vector<2x32xf32>
    %192 = arith.mulf %187, %191 : vector<2x32xf32>
    %c0_58 = arith.constant 0 : index
    %193 = arith.index_cast %162 : i32 to index
    %c0_59 = arith.constant 0 : index
    %c0_60 = arith.constant 0 : index
    %194 = vector.load %arg4[%c0_58, %193, %c0_59, %c0_60] : memref<1x8x2x32xf32, #tpu.memory_space<vmem>>, vector<1x1x2x32xf32>
    %195 = vector.shape_cast %194 : vector<1x1x2x32xf32> to vector<2x32xf32>
    %196 = vector.shape_cast %192 : vector<2x32xf32> to vector<1x1x2x32xf32>
    tpu.vector_store %arg4[%c0_58, %193, %c0_59, %c0_60], %196 {strides = array<i32>} : memref<1x8x2x32xf32, #tpu.memory_space<vmem>>, vector<1x1x2x32xf32>,
    %c5_i32 = arith.constant 5 : i32
    %c2_i32_61 = arith.constant 2 : i32
    %197 = arith.muli %c2_i32_61, %c5_i32 : i32
    %c7_i32_62 = arith.constant 7 : i32
    %198 = arith.subi %c7_i32_62, %197 : i32
    %199 = arith.muli %arg0, %198 : i32
    %200 = arith.addi %c5_i32, %199 : i32
    %201 = arith.index_cast %200 : i32 to index
    %c0_63 = arith.constant 0 : index
    %c0_64 = arith.constant 0 : index
    %202 = vector.load %arg2[%201, %c0_63, %c0_64] : memref<8x2x128xf32, #tpu.memory_space<vmem>>, vector<1x2x128xf32>
    %203 = vector.shape_cast %202 : vector<1x2x128xf32> to vector<2x128xf32>
    %cst_65 = arith.constant dense<0.000000e+00> : vector<2x128xf32>
    %204 = tpu.matmul %192, %4, %cst_65 {dimension_numbers = #tpu.dot_dimension_numbers<[1], [0], [0], [1], [0, 0, 1, 1], [], []>} : vector<2x32xf32>, vector<32x128xf32>, vector<2x128xf32> -> vector<2x128xf32>
    %205 = arith.addf %203, %204 : vector<2x128xf32>
    %206 = vector.extract_strided_slice %205 {offsets = [0, 0], sizes = [2, 32], strides = [1, 1]} : vector<2x128xf32> to vector<2x32xf32>
    %207 = arith.negf %206 : vector<2x32xf32>
    %208 = math.exp %207 : vector<2x32xf32>
    %cst_66 = arith.constant 1.000000e+00 : f32
    %209 = vector.broadcast %cst_66 : f32 to vector<2x32xf32>
    %210 = arith.addf %209, %208 : vector<2x32xf32>
    %211 = arith.divf %209, %210 : vector<2x32xf32>
    %212 = vector.extract_strided_slice %205 {offsets = [0, 32], sizes = [2, 32], strides = [1, 1]} : vector<2x128xf32> to vector<2x32xf32>
    %213 = arith.negf %212 : vector<2x32xf32>
    %214 = math.exp %213 : vector<2x32xf32>
    %cst_67 = arith.constant 1.000000e+00 : f32
    %215 = vector.broadcast %cst_67 : f32 to vector<2x32xf32>
    %216 = arith.addf %215, %214 : vector<2x32xf32>
    %217 = arith.divf %215, %216 : vector<2x32xf32>
    %218 = vector.extract_strided_slice %205 {offsets = [0, 64], sizes = [2, 32], strides = [1, 1]} : vector<2x128xf32> to vector<2x32xf32>
    %219 = math.tanh %218 : vector<2x32xf32>
    %220 = vector.extract_strided_slice %205 {offsets = [0, 96], sizes = [2, 32], strides = [1, 1]} : vector<2x128xf32> to vector<2x32xf32>
    %221 = arith.negf %220 : vector<2x32xf32>
    %222 = math.exp %221 : vector<2x32xf32>
    %cst_68 = arith.constant 1.000000e+00 : f32
    %223 = vector.broadcast %cst_68 : f32 to vector<2x32xf32>
    %224 = arith.addf %223, %222 : vector<2x32xf32>
    %225 = arith.divf %223, %224 : vector<2x32xf32>
    %226 = arith.mulf %217, %190 : vector<2x32xf32>
    %227 = arith.mulf %211, %219 : vector<2x32xf32>
    %228 = arith.addf %226, %227 : vector<2x32xf32>
    %229 = math.tanh %228 : vector<2x32xf32>
    %230 = arith.mulf %225, %229 : vector<2x32xf32>
    %c0_69 = arith.constant 0 : index
    %231 = arith.index_cast %200 : i32 to index
    %c0_70 = arith.constant 0 : index
    %c0_71 = arith.constant 0 : index
    %232 = vector.load %arg4[%c0_69, %231, %c0_70, %c0_71] : memref<1x8x2x32xf32, #tpu.memory_space<vmem>>, vector<1x1x2x32xf32>
    %233 = vector.shape_cast %232 : vector<1x1x2x32xf32> to vector<2x32xf32>
    %234 = vector.shape_cast %230 : vector<2x32xf32> to vector<1x1x2x32xf32>
    tpu.vector_store %arg4[%c0_69, %231, %c0_70, %c0_71], %234 {strides = array<i32>} : memref<1x8x2x32xf32, #tpu.memory_space<vmem>>, vector<1x1x2x32xf32>,
    %c6_i32 = arith.constant 6 : i32
    %c2_i32_72 = arith.constant 2 : i32
    %235 = arith.muli %c2_i32_72, %c6_i32 : i32
    %c7_i32_73 = arith.constant 7 : i32
    %236 = arith.subi %c7_i32_73, %235 : i32
    %237 = arith.muli %arg0, %236 : i32
    %238 = arith.addi %c6_i32, %237 : i32
    %239 = arith.index_cast %238 : i32 to index
    %c0_74 = arith.constant 0 : index
    %c0_75 = arith.constant 0 : index
    %240 = vector.load %arg2[%239, %c0_74, %c0_75] : memref<8x2x128xf32, #tpu.memory_space<vmem>>, vector<1x2x128xf32>
    %241 = vector.shape_cast %240 : vector<1x2x128xf32> to vector<2x128xf32>
    %cst_76 = arith.constant dense<0.000000e+00> : vector<2x128xf32>
    %242 = tpu.matmul %230, %4, %cst_76 {dimension_numbers = #tpu.dot_dimension_numbers<[1], [0], [0], [1], [0, 0, 1, 1], [], []>} : vector<2x32xf32>, vector<32x128xf32>, vector<2x128xf32> -> vector<2x128xf32>
    %243 = arith.addf %241, %242 : vector<2x128xf32>
    %244 = vector.extract_strided_slice %243 {offsets = [0, 0], sizes = [2, 32], strides = [1, 1]} : vector<2x128xf32> to vector<2x32xf32>
    %245 = arith.negf %244 : vector<2x32xf32>
    %246 = math.exp %245 : vector<2x32xf32>
    %cst_77 = arith.constant 1.000000e+00 : f32
    %247 = vector.broadcast %cst_77 : f32 to vector<2x32xf32>
    %248 = arith.addf %247, %246 : vector<2x32xf32>
    %249 = arith.divf %247, %248 : vector<2x32xf32>
    %250 = vector.extract_strided_slice %243 {offsets = [0, 32], sizes = [2, 32], strides = [1, 1]} : vector<2x128xf32> to vector<2x32xf32>
    %251 = arith.negf %250 : vector<2x32xf32>
    %252 = math.exp %251 : vector<2x32xf32>
    %cst_78 = arith.constant 1.000000e+00 : f32
    %253 = vector.broadcast %cst_78 : f32 to vector<2x32xf32>
    %254 = arith.addf %253, %252 : vector<2x32xf32>
    %255 = arith.divf %253, %254 : vector<2x32xf32>
    %256 = vector.extract_strided_slice %243 {offsets = [0, 64], sizes = [2, 32], strides = [1, 1]} : vector<2x128xf32> to vector<2x32xf32>
    %257 = math.tanh %256 : vector<2x32xf32>
    %258 = vector.extract_strided_slice %243 {offsets = [0, 96], sizes = [2, 32], strides = [1, 1]} : vector<2x128xf32> to vector<2x32xf32>
    %259 = arith.negf %258 : vector<2x32xf32>
    %260 = math.exp %259 : vector<2x32xf32>
    %cst_79 = arith.constant 1.000000e+00 : f32
    %261 = vector.broadcast %cst_79 : f32 to vector<2x32xf32>
    %262 = arith.addf %261, %260 : vector<2x32xf32>
    %263 = arith.divf %261, %262 : vector<2x32xf32>
    %264 = arith.mulf %255, %228 : vector<2x32xf32>
    %265 = arith.mulf %249, %257 : vector<2x32xf32>
    %266 = arith.addf %264, %265 : vector<2x32xf32>
    %267 = math.tanh %266 : vector<2x32xf32>
    %268 = arith.mulf %263, %267 : vector<2x32xf32>
    %c0_80 = arith.constant 0 : index
    %269 = arith.index_cast %238 : i32 to index
    %c0_81 = arith.constant 0 : index
    %c0_82 = arith.constant 0 : index
    %270 = vector.load %arg4[%c0_80, %269, %c0_81, %c0_82] : memref<1x8x2x32xf32, #tpu.memory_space<vmem>>, vector<1x1x2x32xf32>
    %271 = vector.shape_cast %270 : vector<1x1x2x32xf32> to vector<2x32xf32>
    %272 = vector.shape_cast %268 : vector<2x32xf32> to vector<1x1x2x32xf32>
    tpu.vector_store %arg4[%c0_80, %269, %c0_81, %c0_82], %272 {strides = array<i32>} : memref<1x8x2x32xf32, #tpu.memory_space<vmem>>, vector<1x1x2x32xf32>,
    %c7_i32_83 = arith.constant 7 : i32
    %c2_i32_84 = arith.constant 2 : i32
    %273 = arith.muli %c2_i32_84, %c7_i32_83 : i32
    %c7_i32_85 = arith.constant 7 : i32
    %274 = arith.subi %c7_i32_85, %273 : i32
    %275 = arith.muli %arg0, %274 : i32
    %276 = arith.addi %c7_i32_83, %275 : i32
    %277 = arith.index_cast %276 : i32 to index
    %c0_86 = arith.constant 0 : index
    %c0_87 = arith.constant 0 : index
    %278 = vector.load %arg2[%277, %c0_86, %c0_87] : memref<8x2x128xf32, #tpu.memory_space<vmem>>, vector<1x2x128xf32>
    %279 = vector.shape_cast %278 : vector<1x2x128xf32> to vector<2x128xf32>
    %cst_88 = arith.constant dense<0.000000e+00> : vector<2x128xf32>
    %280 = tpu.matmul %268, %4, %cst_88 {dimension_numbers = #tpu.dot_dimension_numbers<[1], [0], [0], [1], [0, 0, 1, 1], [], []>} : vector<2x32xf32>, vector<32x128xf32>, vector<2x128xf32> -> vector<2x128xf32>
    %281 = arith.addf %279, %280 : vector<2x128xf32>
    %282 = vector.extract_strided_slice %281 {offsets = [0, 0], sizes = [2, 32], strides = [1, 1]} : vector<2x128xf32> to vector<2x32xf32>
    %283 = arith.negf %282 : vector<2x32xf32>
    %284 = math.exp %283 : vector<2x32xf32>
    %cst_89 = arith.constant 1.000000e+00 : f32
    %285 = vector.broadcast %cst_89 : f32 to vector<2x32xf32>
    %286 = arith.addf %285, %284 : vector<2x32xf32>
    %287 = arith.divf %285, %286 : vector<2x32xf32>
    %288 = vector.extract_strided_slice %281 {offsets = [0, 32], sizes = [2, 32], strides = [1, 1]} : vector<2x128xf32> to vector<2x32xf32>
    %289 = arith.negf %288 : vector<2x32xf32>
    %290 = math.exp %289 : vector<2x32xf32>
    %cst_90 = arith.constant 1.000000e+00 : f32
    %291 = vector.broadcast %cst_90 : f32 to vector<2x32xf32>
    %292 = arith.addf %291, %290 : vector<2x32xf32>
    %293 = arith.divf %291, %292 : vector<2x32xf32>
    %294 = vector.extract_strided_slice %281 {offsets = [0, 64], sizes = [2, 32], strides = [1, 1]} : vector<2x128xf32> to vector<2x32xf32>
    %295 = math.tanh %294 : vector<2x32xf32>
    %296 = vector.extract_strided_slice %281 {offsets = [0, 96], sizes = [2, 32], strides = [1, 1]} : vector<2x128xf32> to vector<2x32xf32>
    %297 = arith.negf %296 : vector<2x32xf32>
    %298 = math.exp %297 : vector<2x32xf32>
    %cst_91 = arith.constant 1.000000e+00 : f32
    %299 = vector.broadcast %cst_91 : f32 to vector<2x32xf32>
    %300 = arith.addf %299, %298 : vector<2x32xf32>
    %301 = arith.divf %299, %300 : vector<2x32xf32>
    %302 = arith.mulf %293, %266 : vector<2x32xf32>
    %303 = arith.mulf %287, %295 : vector<2x32xf32>
    %304 = arith.addf %302, %303 : vector<2x32xf32>
    %305 = math.tanh %304 : vector<2x32xf32>
    %306 = arith.mulf %301, %305 : vector<2x32xf32>
    %c0_92 = arith.constant 0 : index
    %307 = arith.index_cast %276 : i32 to index
    %c0_93 = arith.constant 0 : index
    %c0_94 = arith.constant 0 : index
    %308 = vector.load %arg4[%c0_92, %307, %c0_93, %c0_94] : memref<1x8x2x32xf32, #tpu.memory_space<vmem>>, vector<1x1x2x32xf32>
    %309 = vector.shape_cast %308 : vector<1x1x2x32xf32> to vector<2x32xf32>
    %310 = vector.shape_cast %306 : vector<2x32xf32> to vector<1x1x2x32xf32>
    tpu.vector_store %arg4[%c0_92, %307, %c0_93, %c0_94], %310 {strides = array<i32>} : memref<1x8x2x32xf32, #tpu.memory_space<vmem>>, vector<1x1x2x32xf32>,
    %c8_i32 = arith.constant 8 : i32
    %c0_95 = arith.constant 0 : index
    %c0_96 = arith.constant 0 : index
    %311 = vector.load %arg6[%c0_95, %c0_96] : memref<2x32xf32, #tpu.memory_space<vmem>>, vector<2x32xf32>
    tpu.vector_store %arg6[%c0_95, %c0_96], %306 {strides = array<i32>} : memref<2x32xf32, #tpu.memory_space<vmem>>, vector<2x32xf32>,
    %c0_97 = arith.constant 0 : index
    %c0_98 = arith.constant 0 : index
    %312 = vector.load %arg7[%c0_97, %c0_98] : memref<2x32xf32, #tpu.memory_space<vmem>>, vector<2x32xf32>
    tpu.vector_store %arg7[%c0_97, %c0_98], %304 {strides = array<i32>} : memref<2x32xf32, #tpu.memory_space<vmem>>, vector<2x32xf32>,
    %c0_i32_99 = arith.constant 0 : i32
    %313 = arith.cmpi eq, %arg1, %c0_i32_99 : i32
    %314 = arith.extui %313 : i1 to i32
    %c0_i32_100 = arith.constant 0 : i32
    %315 = arith.cmpi ne, %314, %c0_i32_100 : i32
    scf.if %315 {
      %c0_101 = arith.constant 0 : index
      %c0_102 = arith.constant 0 : index
      %c0_103 = arith.constant 0 : index
      %316 = vector.load %arg5[%c0_101, %c0_102, %c0_103] : memref<1x2x32xf32, #tpu.memory_space<vmem>>, vector<1x2x32xf32>
      %317 = vector.shape_cast %316 : vector<1x2x32xf32> to vector<2x32xf32>
      %318 = vector.shape_cast %304 : vector<2x32xf32> to vector<1x2x32xf32>
      tpu.vector_store %arg5[%c0_101, %c0_102, %c0_103], %318 {strides = array<i32>} : memref<1x2x32xf32, #tpu.memory_space<vmem>>, vector<1x2x32xf32>,
    } else {
    }
    return
  }
  func.func @transform_0(%arg0: i32, %arg1: i32) -> (i32, i32, i32) {
    %c2_i32 = arith.constant 2 : i32
    %0 = arith.muli %c2_i32, %arg1 : i32
    %c0_i32 = arith.constant 0 : i32
    %1 = arith.subi %c0_i32, %0 : i32
    %2 = arith.muli %arg0, %1 : i32
    %3 = arith.addi %arg1, %2 : i32
    %c0_i32_0 = arith.constant 0 : i32
    %c0_i32_1 = arith.constant 0 : i32
    return %3, %c0_i32_0, %arg0 : i32, i32, i32
  }
  func.func @transform_1(%arg0: i32, %arg1: i32) -> (i32, i32, i32) {
    %c0_i32 = arith.constant 0 : i32
    %c0_i32_0 = arith.constant 0 : i32
    %c0_i32_1 = arith.constant 0 : i32
    return %arg0, %c0_i32, %c0_i32_0 : i32, i32, i32
  }
  func.func @transform_2(%arg0: i32, %arg1: i32) -> (i32, i32, i32, i32) {
    %c2_i32 = arith.constant 2 : i32
    %0 = arith.muli %c2_i32, %arg1 : i32
    %c0_i32 = arith.constant 0 : i32
    %1 = arith.subi %c0_i32, %0 : i32
    %2 = arith.muli %arg0, %1 : i32
    %3 = arith.addi %arg1, %2 : i32
    %c0_i32_0 = arith.constant 0 : i32
    %c0_i32_1 = arith.constant 0 : i32
    %c0_i32_2 = arith.constant 0 : i32
    return %arg0, %3, %c0_i32_0, %c0_i32_1 : i32, i32, i32, i32
  }
  func.func @transform_3(%arg0: i32, %arg1: i32) -> (i32, i32, i32) {
    %c0_i32 = arith.constant 0 : i32
    %c0_i32_0 = arith.constant 0 : i32
    %c0_i32_1 = arith.constant 0 : i32
    return %arg0, %c0_i32, %c0_i32_0 : i32, i32, i32
  }
}

</mosaic_0001>

<bundles_post_ra>
// kernel: recurrent_encoder_forward.2
= control target key start
LH: loop header
LB: loop body
LE: loop exit
PB: predicated region body
PF: predicated region fallthrough
CT: control target
= control target key end

     0   :  { %vm30_vm0 = vcmask 261120   ;;  %s168_s1 = inlined_call_operand.vmem [shape: f32[32,256], index: 1, kind: input, shape index: {}]   ;;  %s169_s0 = inlined_call_operand.vmem [shape: f32[16,32], index: 0, kind: input, shape index: {}]   ;;  %s170_s2 = inlined_call_operand.vmem [shape: f32[1,256], index: 2, kind: input, shape index: {}]   ;;  %s171_s3 = inlined_call_operand.vmem [shape: f32[16,256], index: 3, kind: output, shape index: {}]  }
   0x1   :  { %v22_v0 = vld [vmem:[%s168_s1 + $0x30] sm:$0xff]  ;;  %v23_v1 = vld [vmem:[%s168_s1 + $0x38] sm:$0xff]  ;;  %v20_v2 = vld [vmem:[%s168_s1 + $0x20] sm:$0xff] }
   0x2   :  { %95 = vmatpush.msra.mxu2 %v22_v0  ;;  %99 = vmatpush.msra.mxu3 %v23_v1  ;;  %v21_v3 = vld [vmem:[%s168_s1 + $0x28] sm:$0xff]  ;;  %v18_v4 = vld [vmem:[%s168_s1 + $0x10] sm:$0xff]  ;;  %v19_v5 = vld [vmem:[%s168_s1 + $0x18] sm:$0xff] }
   0x3   :  { %49 = vmatpush.msra.mxu0 %v22_v0  ;;  %72 = vmatpush.msra.mxu1 %v23_v1  ;;  %v16_v6 = vld [vmem:[%s168_s1] sm:$0xff]  ;;  %v17_v7 = vld [vmem:[%s168_s1 + $0x8] sm:$0xff] }
   0x4   :  { %96 = vmatpush.msra.mxu2 %v20_v2  ;;  %100 = vmatpush.msra.mxu3 %v21_v3  ;;  %v15_v8 = vld [vmem:[%s169_s0 + $0x8] sm:$0xff]  ;;  %v14_v9 = vld [vmem:[%s169_s0] sm:$0xff] }
   0x5   :  { %50 = vmatpush.msra.mxu0 %v20_v2  ;;  %73 = vmatpush.msra.mxu1 %v21_v3  ;;  %v24_v10 = vld [vmem:[%s170_s2] sm:$0x3] }
   0x6   :  { %97 = vmatpush.msra.mxu2 %v18_v4  ;;  %101 = vmatpush.msra.mxu3 %v19_v5  ;;  %v26_v11 = vperm.slane %v24_v10, 0  ;;  %v27_v12 = vperm.slane %v24_v10, 1 }
   0x7   :  { %51 = vmatpush.msra.mxu0 %v18_v4  ;;  %74 = vmatpush.msra.mxu1 %v19_v5 }
   0x8   :  { %98 = vmatpush.msra.mxu2 %v16_v6  ;;  %102 = vmatpush.msra.mxu3 %v17_v7 }
   0x9   :  { %92 = vmatmul.msk.f32.vlgmr.msra.gmra.mxu2 %vm30_vm0, %v15_v8  ;;  %94 = vmatmul.msk.f32.vlgmr.msra.gmra.mxu3 %vm30_vm0, %v15_v8 }
   0xa   :  { %52 = vmatpush.msra.mxu0 %v16_v6  ;;  %75 = vmatpush.msra.mxu1 %v17_v7 }
   0xb   :  { %91 = vmatmul.msk.f32.vlgmr.msra.gmra.mxu0 %vm30_vm0, %v14_v9  ;;  %93 = vmatmul.msk.f32.vlgmr.msra.gmra.mxu1 %vm30_vm0, %v14_v9 }
  0x88   :  { %v54_v13 = vpop.f32.mrf.mxu0  ;;  %v77_v14 = vpop.f32.mrf.mxu1 }
  0x89   :  { %v55_v15 = vadd.f32 %v54_v13, %v26_v11  ;;  %v78_v16 = vadd.f32 %v77_v14, %v27_v12 }
  0x8b   :  { %83 = vst [vmem:[%s171_s3] sm:$0xff] %v55_v15 }
  0x8c   :  { %v57_v17 = vpop.f32.mrf.mxu2  ;;  %84 = vst [vmem:[%s171_s3 + $0x8] sm:$0xff] %v78_v16  ;;  %v80_v18 = vpop.f32.mrf.mxu3 }
  0x8d   :  { %v58_v19 = vadd.f32 %v57_v17, %v26_v11  ;;  %v81_v20 = vadd.f32 %v80_v18, %v27_v12 }
  0x8f   :  { %85 = vst [vmem:[%s171_s3 + $0x10] sm:$0xff] %v58_v19 }
  0x90   :  { %86 = vst [vmem:[%s171_s3 + $0x18] sm:$0xff] %v81_v20 }

// kernel: recurrent_encoder_forward.3
= control target key start
LH: loop header
LB: loop body
LE: loop exit
PB: predicated region body
PF: predicated region fallthrough
CT: control target
= control target key end

     0   :  { %9 = vsyncpa [#allocation6], 0  ;;  %s1674_s0 = inlined_call_operand.vmem [shape: f32[8,2,256], index: 0, kind: input, shape index: {}]   ;;  %s1675_s1 = inlined_call_operand.vmem [shape: f32[2,32,128], index: 1, kind: input, shape index: {}]   ;;  %s1676_s2 = inlined_call_operand.vmem [shape: f32[2,8,2,32], index: 2, kind: output, shape index: {0}]   ;;  %s1677_s3 = inlined_call_operand.hbm [shape: f32[2,2,32], index: 3, kind: output, shape index: {1}]  }
   0x1   :  { %11 = vsyncpa [#allocation6 + $0x1], 0  ;;  %s1441_s12 = smov 0   ;;  %s1443_s13 = smov 0  }
   0x2   :  { %s1445_s14 = smov 0   ;;  %s1447_s15 = smov 0  }
   0x3   :  { %s1449_s16 = smov 0   ;;  %s1451_s17 = smov 0  }
   0x4 LB: > { %s1153_s18 = sadd.s32 4294967295, %s1415_s17   ;;  %s1154_s19 = sadd.s32 4294967294, %s1415_s17   ;;  %s1415_s17 = sphi %s1451_s17, %s17_s17   ;;  %s1411_s16 = sphi %s1449_s16, %s1688_s16   ;;  %s1407_s15 = sphi %s1447_s15, %s1687_s15   ;;  %s1403_s14 = sphi %s1445_s14, %s1686_s14   ;;  %s1399_s13 = sphi %s1443_s13, %s1685_s13   ;;  %s1395_s12 = sphi %s1441_s12, %s1684_s12  }
   0x5   : > { %s29_s20 = sadd.s32 1, %s1411_s16  ;;  %s46_s21 = sadd.s32 1, %s1403_s14 }
   0x6   : > { %p31_p0 = scmp.ge.s32.totalorder %s29_s20, 2  ;;  %p53_p1 = scmp.ne.s32.totalorder %s1403_s14, %s1399_s13 }
   0x7   : > { %p54_p2 = scmp.eq.s32.totalorder %s1415_s17, 0  ;;  %p145_p3 = scmp.eq.s32.totalorder %s1153_s18, 1 }
   0x8   : > { %s1690_s20 = smov (%p31_p0, %s29_s20), 0  ;;  %p150_p6 = scmp.ne.s32.totalorder %s1399_s13, %s1395_s12 }
   0x9   : > { %p55_p4 = por %p54_p2, %p53_p1  ;;  %p1480_p5 = por %p145_p3, %p53_p1 }
   0xa   : > { %s42_s23 = ssub.s32 %s1411_s16, %s1690_s20  ;;  %p151_p8 = scmp.eq.s32.totalorder %s1154_s19, 1 }
   0xb   : > { %p44_p7 = scmp.eq.s32.totalorder %s42_s23, 0  ;;  %p1156_p10 = scmp.ge.s32.totalorder %s1415_s17, 2 }
   0xc   : > { %p1491_p9 = por %p151_p8, %p150_p6 }
   0xd   : > { %s1489_s24 = scalar_select %p44_p7, %s1403_s14, %s46_s21  }
   0xe   : > { %167 = sbr.rel (%p1156_p10) target bundleno = 31 (0x1f), region = 16 }
  0x13   : > { %170 = sbr.rel (!%p55_p4) target bundleno = 31 (0x1f), region = 20  ;;  %s172_s26 = sand.u32 (%p55_p4), 1, %s1403_s14  }
  0x14   : > { %s1158_s27 = sshll.u32 (%p55_p4), %s1411_s16, 1  ;;  %s1157_s28 = sshll.u32 (%p55_p4), %s172_s26, 4 }
  0x15   : > { %s183_s4 = scalar_lea.vmem (%p55_p4), %s1674_s0, %s1158_s27  ;;  %s174_s5 = scalar_lea.vmem (%p55_p4), [#allocation4], %s1157_s28 }
  0x16   : > { %v200_v0 = vld [vmem:[%s183_s4] sm:$0x3] (%p55_p4)  ;;  %v202_v1 = vld [vmem:[%s183_s4 + $0x4] sm:$0x3] (%p55_p4)  ;;  %v204_v2 = vld [vmem:[%s183_s4 + $0x8] sm:$0x3] (%p55_p4) }
  0x17   : > { %201 = vst [vmem:[%s174_s5] sm:$0x3] (%p55_p4), %v200_v0  ;;  %v206_v3 = vld [vmem:[%s183_s4 + $0xc] sm:$0x3] (%p55_p4)  ;;  %v208_v4 = vld [vmem:[%s183_s4 + $0x10] sm:$0x3] (%p55_p4) }
  0x18   : > { %203 = vst [vmem:[%s174_s5 + $0x2] sm:$0x3] %v202_v1  ;;  %v210_v5 = vld [vmem:[%s183_s4 + $0x14] sm:$0x3]  ;;  %v212_v6 = vld [vmem:[%s183_s4 + $0x18] sm:$0x3] }
  0x19   : > { %205 = vst [vmem:[%s174_s5 + $0x4] sm:$0x3] %v204_v2  ;;  %v214_v7 = vld [vmem:[%s183_s4 + $0x1c] sm:$0x3] }
  0x1a   : > { %207 = vst [vmem:[%s174_s5 + $0x6] sm:$0x3] %v206_v3 }
  0x1b   : > { %209 = vst [vmem:[%s174_s5 + $0x8] sm:$0x3] %v208_v4 }
  0x1c   : > { %211 = vst [vmem:[%s174_s5 + $0xa] sm:$0x3] %v210_v5 }
  0x1d   : > { %213 = vst [vmem:[%s174_s5 + $0xc] sm:$0x3] %v212_v6 }
  0x1e   : > { %215 = vst [vmem:[%s174_s5 + $0xe] sm:$0x3] %v214_v7 }
  0x1f PF: > { %p1159_p11 = scmp.ge.s32.totalorder %s1415_s17, 1  ;;  %p262_p12 = scmp.lt.s32.totalorder %s1415_s17, 3 }
  0x21   : > { %p263_p13 = pnand %p1159_p11, %p262_p12 }
  0x22   : > { %p315_p0 = scmp.lt.s32.totalorder (!%p263_p13), %s1407_s15, 1  ;;  %s1517_s11 = sand.u32 (!%p263_p13), 1, %s1399_s13  }
  0x23   : > { %266 = sbr.rel (%p263_p13) target bundleno = 4702 (0x125e), region = 65  ;;  %s1160_s18 = sshll.u32 (!%p263_p13), %s1517_s11, 4 }
  0x24   : > { %s1166_s19 = smul.u32 (!%p263_p13), 14, %s1407_s15  ;;  %s1521_s21 = scalar_lea.vmem (!%p263_p13), [#allocation4], %s1160_s18 }
  0x25   : > { %s1418_s26 = smov (!%p263_p13), 64   ;;  %s1679_s27 = smov (!%p263_p13), 32  }
  0x26   : > { %s353_s23 = scalar_lea.vmem (!%p263_p13), %s1521_s21, %s1166_s19 [#allocation4]  ;;  %s1175_s9 = smul.u32 (!%p263_p13), 6, %s1407_s15 }
  0x27   : > { %s640_s29 = ssub.s32 (!%p263_p13), 4, %s1407_s15 }
  0x28   : > { %vm342_vm0 = vcmask 254976   ;;  %v1417_v8 = vmov 0.0   ;;  %s1508_s6 = scalar_select %p315_p0, %s1407_s15, 1  ;;  %vm355_vm1 = vcmask 261120   ;;  %v354_v14 = vld [vmem:[%s353_s23] sm:$0x3] }
  0x29   : > { %343 = vst.msk [vmem:[#allocation2] sm:$0x3] %vm342_vm0, %v1417_v8  ;;  %s1582_s30 = sshll.u32 %s640_s29, 1 }
  0x2a   : > { %344 = vst.msk [vmem:[#allocation3] sm:$0x3] %vm342_vm0, %v1417_v8  ;;  %s1212_s7 = sshll.u32 %s1508_s6, 5  ;;  %s1213_s28 = sshll.u32 %s1508_s6, 4 }
  0x2b   : > { %s319_s10 = scalar_lea.vmem %s1675_s1, %s1212_s7  ;;  %s1535_s4 = scalar_lea.vmem %s1676_s2, %s1213_s28 }
  0x2c   : > { %v348_v9 = vld [vmem:[%s319_s10 + $0x18] sm:$0xff]  ;;  %v347_v10 = vld [vmem:[%s319_s10 + $0x10] sm:$0xff]  ;;  %v346_v11 = vld [vmem:[%s319_s10 + $0x8] sm:$0xff]  ;;  %s425_s5 = scalar_lea.vmem %s1535_s4, %s1166_s19  ;;  %s1169_s7 = smul.u32 10, %s1407_s15 }
  0x2d   : > { %371 = vmatpush.msra.mxu0 %v348_v9  ;;  %447 = vmatpush.msra.mxu1 %v348_v9  ;;  %v345_v12 = vld [vmem:[%s319_s10] sm:$0xff]  ;;  %s1049_s10 = scalar_lea.vmem %s1521_s21, %s1175_s9 [#allocation4]  ;;  %s1053_s18 = scalar_lea.vmem %s1535_s4, %s1175_s9 }
  0x2e   : > { %518 = vmatpush.msra.mxu2 %v348_v9  ;;  %588 = vmatpush.msra.mxu3 %v348_v9  ;;  %s1041_s8 = scalar_lea.vmem %s1521_s21, %s1169_s7 [#allocation4]  ;;  %s1045_s6 = scalar_lea.vmem %s1535_s4, %s1169_s7  ;;  %v1176_v4 = vld [vmem:[%s1049_s10 + $0x4] sm:$0x3] }
  0x2f   : > { %372 = vmatpush.msra.mxu0 %v347_v10  ;;  %448 = vmatpush.msra.mxu1 %v347_v10  ;;  %v1170_v42 = vld [vmem:[%s1041_s8 + $0x2] sm:$0x3]  ;;  %s1569_s19 = sshll.u32 %s1407_s15, 1  ;;  %s708_s7 = scalar_lea.vmem %s1535_s4, %s1582_s30 }
  0x30   : > { %519 = vmatpush.msra.mxu2 %v347_v10  ;;  %589 = vmatpush.msra.mxu3 %v347_v10  ;;  %v349_v13 = vld [vmem:[#allocation2] sm:$0x3]  ;;  %s1056_s23 = scalar_lea.vmem %s1521_s21, %s1569_s19 [#allocation4]  ;;  %s1059_s28 = scalar_lea.vmem %s1535_s4, %s1569_s19 }
  0x31   : > { %373 = vmatpush.msra.mxu0 %v346_v11  ;;  %449 = vmatpush.msra.mxu1 %v346_v11  ;;  %v350_v18 = vld [vmem:[#allocation3] sm:$0x3]  ;;  %s1190_s8 = smul.u32 4294967290, %s1407_s15 }
  0x32   : > { %520 = vmatpush.msra.mxu2 %v346_v11  ;;  %590 = vmatpush.msra.mxu3 %v346_v11  ;;  %s1196_s10 = smul.u32 4294967286, %s1407_s15 }
  0x33   : > { %374 = vmatpush.msra.mxu0 %v345_v12  ;;  %450 = vmatpush.msra.mxu1 %v345_v12  ;;  %s1071_s9 = scalar_lea.vmem %s1535_s4, %s1190_s8 }
  0x34   : > { %1167 = vmatmul.msk.f32.vlgmr.msra.gmra.mxu0 %vm355_vm1, %v349_v13  ;;  %521 = vmatpush.msra.mxu2 %v345_v12 }
  0x35   : > { %591 = vmatpush.msra.mxu3 %v345_v12  ;;  %658 = vmatpush.msrb.mxu0 %v348_v9 }
  0x36   : > { %729 = vmatpush.msrb.mxu1 %v348_v9  ;;  %800 = vmatpush.msrb.mxu2 %v348_v9 }
  0x37   : > { %659 = vmatpush.msrb.mxu0 %v347_v10  ;;  %871 = vmatpush.msrb.mxu3 %v348_v9 }
  0x38   : > { %730 = vmatpush.msrb.mxu1 %v347_v10  ;;  %801 = vmatpush.msrb.mxu2 %v347_v10 }
  0x39   : > { %660 = vmatpush.msrb.mxu0 %v346_v11  ;;  %872 = vmatpush.msrb.mxu3 %v347_v10 }
  0x3a   : > { %731 = vmatpush.msrb.mxu1 %v346_v11  ;;  %802 = vmatpush.msrb.mxu2 %v346_v11 }
  0x3b   : > { %661 = vmatpush.msrb.mxu0 %v345_v12  ;;  %873 = vmatpush.msrb.mxu3 %v346_v11 }
  0x3c   : > { %732 = vmatpush.msrb.mxu1 %v345_v12  ;;  %803 = vmatpush.msrb.mxu2 %v345_v12 }
  0x3d   : > { %874 = vmatpush.msrb.mxu3 %v345_v12 }
  0xb1   : > { %v376_v15 = vpop.f32.mrf.mxu0 }
  0xb2   : > { %v379_v16 = vadd.f32 %v376_v15, %v354_v14 }
  0xb4   : > { %1273 = vtanh.f32 %v379_v16  ;;  %v1168_v19 = vmul.f32 -1.442695, %v379_v16 }
  0xb6   : > { %1275 = vpow2.f32 %v1168_v19 }
  0xba   : > { %v1274_v17 = vpop.eup %1273 }
  0xbb   : > { %406 = vrot.lane.b32.xlu0 %v1274_v17, %s1418_s26 }
  0xbc   : > { %v1276_v20 = vpop.eup %1275 }
  0xbd   : > { %v383_v21 = vadd.f32 1.0, %v1276_v20 }
  0xbf   : > { %1277 = vrcp.f32 %v383_v21  ;;  %v395_v27 = vand.u32 2147483648, %v383_v21  ;;  %vm389_vm3 = vweird.f32 %v383_v21  ;;  %v393_v28 = vand.u32 2147483647, %v383_v21 }
  0xc1   : > { %v396_v30 = vor.u32 1.1754944e-38, %v395_v27  ;;  %vm394_vm5 = vcmp.eq.f32.partialorder %v393_v28, 8.507059e+37 }
  0xc3   : > { %401 = vrot.lane.b32.xlu0 %v350_v18, %s1679_s27 }
  0xc5   : > { %v1278_v22 = vpop.eup %1277 }
  0xc6   : > { %v385_v23 = vmul.f32 %v1278_v22, %v383_v21  ;;  %vm390_vm2 = vweird.f32 %v1278_v22 }
  0xc7   : > { %vm391_vm4 = vmor %vm389_vm3, %vm390_vm2 }
  0xc8   : > { %v386_v24 = vsub.f32 1.0, %v385_v23 }
  0xca   : > { %v387_v25 = vmul.f32 %v1278_v22, %v386_v24 }
  0xcc   : > { %v388_v26 = vadd.f32 %v1278_v22, %v387_v25 }
  0xce   : > { %v392_v29 = vsel %vm391_vm4, %v1278_v22, %v388_v26 }
  0xcf   : > { %v397_v32 = vsel %vm394_vm5, %v396_v30, %v392_v29  ;;  %v1182_v30 = vld [vmem:[%s1056_s23 + $0x6] sm:$0x3]  ;;  %s1079_s23 = scalar_lea.vmem %s1535_s4, %s1196_s10 }
 0x12d   : > { %v407_v31 = vpop.permute.xlu0 %406 }
 0x12e   : > { %v409_v33 = vmul.f32 %v407_v31, %v397_v32 }
 0x130   : > { %411 = vrot.lane.b32.xlu1 %v409_v33, %s1679_s27 }
 0x135   : > { %v402_v34 = vpop.permute.xlu0 %401 }
 0x136   : > { %v404_v35 = vmul.f32 %v402_v34, %v397_v32 }
 0x1a2   : > { %v412_v36 = vpop.permute.xlu1 %411 }
 0x1a3   : > { %v414_v37 = vadd.f32 %v412_v36, %v404_v35 }
 0x1a5   : > { %1279 = vtanh.f32 %v414_v37 }
 0x1ab   : > { %v1280_v38 = vpop.eup %1279 }
 0x1ac   : > { %417 = vrot.lane.b32.xlu1 %v1280_v38, %s1418_s26 }
 0x21e   : > { %v418_v39 = vpop.permute.xlu1 %417 }
 0x21f   : > { %v420_v40 = vmul.f32 %v418_v39, %v397_v32 }
 0x221   : > { %422 = vrot.lane.b32.xlu2 %v420_v40, %s1679_s27 }
 0x27b   : > { %v423_v41 = vpop.permute.xlu2 %422 }
 0x27c   : > { %427 = vst.msk [vmem:[%s425_s5] sm:$0x3] %vm342_vm0, %v423_v41  ;;  %1171 = vmatmul.msk.f32.vlgmr.msra.gmra.mxu1 %vm355_vm1, %v423_v41  ;;  %s642_s5 = scalar_lea.vmem %s1521_s21, %s1582_s30 [#allocation4]  ;;  %s1161_s30 = sshll.u32 %s1517_s11, 1 }
 0x2f9   : > { %v452_v43 = vpop.f32.mrf.mxu1 }
 0x2fa   : > { %v455_v44 = vadd.f32 %v1170_v42, %v452_v43 }
 0x2fc   : > { %1281 = vtanh.f32 %v455_v44  ;;  %v1172_v46 = vmul.f32 -1.442695, %v455_v44 }
 0x2fe   : > { %1283 = vpow2.f32 %v1172_v46 }
 0x302   : > { %v1282_v45 = vpop.eup %1281 }
 0x303   : > { %478 = vrot.lane.b32.xlu2 %v1282_v45, %s1418_s26 }
 0x304   : > { %v1284_v47 = vpop.eup %1283 }
 0x305   : > { %v459_v48 = vadd.f32 1.0, %v1284_v47 }
 0x307   : > { %1285 = vrcp.f32 %v459_v48  ;;  %v471_v54 = vand.u32 2147483648, %v459_v48  ;;  %vm465_vm7 = vweird.f32 %v459_v48  ;;  %v469_v55 = vand.u32 2147483647, %v459_v48 }
 0x309   : > { %v472_v57 = vor.u32 1.1754944e-38, %v471_v54  ;;  %vm470_vm9 = vcmp.eq.f32.partialorder %v469_v55, 8.507059e+37 }
 0x30d   : > { %v1286_v49 = vpop.eup %1285 }
 0x30e   : > { %v461_v50 = vmul.f32 %v1286_v49, %v459_v48  ;;  %vm466_vm6 = vweird.f32 %v1286_v49 }
 0x30f   : > { %vm467_vm8 = vmor %vm465_vm7, %vm466_vm6 }
 0x310   : > { %v462_v51 = vsub.f32 1.0, %v461_v50 }
 0x312   : > { %v463_v52 = vmul.f32 %v1286_v49, %v462_v51 }
 0x314   : > { %v464_v53 = vadd.f32 %v1286_v49, %v463_v52 }
 0x316   : > { %v468_v56 = vsel %vm467_vm8, %v1286_v49, %v464_v53 }
 0x317   : > { %v473_v59 = vsel %vm470_vm9, %v472_v57, %v468_v56  ;;  %v643_v56 = vld [vmem:[%s642_s5] sm:$0x3]  ;;  %s309_s5 = scalar_lea.vmem [#allocation5], %s1161_s30  ;;  %s1357_s30 = scalar_lea.hbm %s1677_s3, 4 }
 0x318   : > { %v476_v61 = vmul.f32 %v473_v59, %v414_v37 }
 0x35d   : > { %v479_v58 = vpop.permute.xlu2 %478 }
 0x35e   : > { %v481_v60 = vmul.f32 %v479_v58, %v473_v59 }
 0x360   : > { %483 = vrot.lane.b32.xlu0 %v481_v60, %s1679_s27 }
 0x3d2   : > { %v484_v62 = vpop.permute.xlu0 %483 }
 0x3d3   : > { %v486_v63 = vadd.f32 %v484_v62, %v476_v61 }
 0x3d5   : > { %1287 = vtanh.f32 %v486_v63 }
 0x3db   : > { %v1288_v0 = vpop.eup %1287 }
 0x3dc   : > { %489 = vrot.lane.b32.xlu1 %v1288_v0, %s1418_s26 }
 0x44e   : > { %v490_v1 = vpop.permute.xlu1 %489 }
 0x44f   : > { %v492_v2 = vmul.f32 %v490_v1, %v473_v59 }
 0x451   : > { %494 = vrot.lane.b32.xlu2 %v492_v2, %s1679_s27 }
 0x4ab   : > { %v495_v3 = vpop.permute.xlu2 %494 }
 0x4ac   : > { %1174 = vst.msk [vmem:[%s1045_s6 + $0x2] sm:$0x3] %vm342_vm0, %v495_v3  ;;  %1177 = vmatmul.msk.f32.vlgmr.msra.gmra.mxu2 %vm355_vm1, %v495_v3  ;;  %s1067_s6 = scalar_lea.vmem %s1521_s21, %s1190_s8 [#allocation4] }
 0x52f   : > { %v523_v5 = vpop.f32.mrf.mxu2 }
 0x530   : > { %v526_v6 = vadd.f32 %v1176_v4, %v523_v5 }
 0x532   : > { %1289 = vtanh.f32 %v526_v6  ;;  %v1178_v8 = vmul.f32 -1.442695, %v526_v6 }
 0x534   : > { %1291 = vpow2.f32 %v1178_v8 }
 0x538   : > { %v1290_v7 = vpop.eup %1289 }
 0x539   : > { %549 = vrot.lane.b32.xlu0 %v1290_v7, %s1418_s26 }
 0x53a   : > { %v1292_v9 = vpop.eup %1291 }
 0x53b   : > { %v530_v10 = vadd.f32 1.0, %v1292_v9 }
 0x53d   : > { %1293 = vrcp.f32 %v530_v10  ;;  %v542_v16 = vand.u32 2147483648, %v530_v10  ;;  %vm536_vm11 = vweird.f32 %v530_v10  ;;  %v540_v17 = vand.u32 2147483647, %v530_v10 }
 0x53f   : > { %v543_v19 = vor.u32 1.1754944e-38, %v542_v16  ;;  %vm541_vm13 = vcmp.eq.f32.partialorder %v540_v17, 8.507059e+37 }
 0x543   : > { %v1294_v11 = vpop.eup %1293 }
 0x544   : > { %v532_v12 = vmul.f32 %v1294_v11, %v530_v10  ;;  %vm537_vm10 = vweird.f32 %v1294_v11 }
 0x545   : > { %vm538_vm12 = vmor %vm536_vm11, %vm537_vm10 }
 0x546   : > { %v533_v13 = vsub.f32 1.0, %v532_v12 }
 0x548   : > { %v534_v14 = vmul.f32 %v1294_v11, %v533_v13 }
 0x54a   : > { %v535_v15 = vadd.f32 %v1294_v11, %v534_v14 }
 0x54c   : > { %v539_v18 = vsel %vm538_vm12, %v1294_v11, %v535_v15 }
 0x54d   : > { %v544_v21 = vsel %vm541_vm13, %v543_v19, %v539_v18  ;;  %v1191_v18 = vld [vmem:[%s1067_s6 + $0xa] sm:$0x3]  ;;  %s965_s6 = scalar_lea.hbm %s1677_s3, %s1569_s19 }
 0x54e   : > { %v547_v23 = vmul.f32 %v544_v21, %v486_v63 }
 0x5ab   : > { %v550_v20 = vpop.permute.xlu0 %549 }
 0x5ac   : > { %v552_v22 = vmul.f32 %v550_v20, %v544_v21 }
 0x5ae   : > { %554 = vrot.lane.b32.xlu1 %v552_v22, %s1679_s27 }
 0x620   : > { %v555_v24 = vpop.permute.xlu1 %554 }
 0x621   : > { %v557_v25 = vadd.f32 %v555_v24, %v547_v23 }
 0x623   : > { %1295 = vtanh.f32 %v557_v25 }
 0x629   : > { %v1296_v26 = vpop.eup %1295 }
 0x62a   : > { %560 = vrot.lane.b32.xlu2 %v1296_v26, %s1418_s26 }
 0x684   : > { %v561_v27 = vpop.permute.xlu2 %560 }
 0x685   : > { %v563_v28 = vmul.f32 %v561_v27, %v544_v21 }
 0x687   : > { %565 = vrot.lane.b32.xlu0 %v563_v28, %s1679_s27 }
 0x6f9   : > { %v566_v29 = vpop.permute.xlu0 %565 }
 0x6fa   : > { %1180 = vst.msk [vmem:[%s1053_s18 + $0x4] sm:$0x3] %vm342_vm0, %v566_v29  ;;  %1183 = vmatmul.msk.f32.vlgmr.msra.gmra.mxu3 %vm355_vm1, %v566_v29  ;;  %s1075_s18 = scalar_lea.vmem %s1521_s21, %s1196_s10 [#allocation4]  ;;  %s969_s10 = sshll.u32 %s965_s6, 4  ;;  %s970_s10 = int_to_ptr.hbm [resolvable:$true] %s969_s10 }
 0x77d   : > { %v593_v31 = vpop.f32.mrf.mxu3 }
 0x77e   : > { %v596_v32 = vadd.f32 %v1182_v30, %v593_v31 }
 0x780   : > { %1297 = vtanh.f32 %v596_v32  ;;  %v1184_v34 = vmul.f32 -1.442695, %v596_v32 }
 0x782   : > { %1299 = vpow2.f32 %v1184_v34 }
 0x786   : > { %v1298_v33 = vpop.eup %1297 }
 0x787   : > { %619 = vrot.lane.b32.xlu1 %v1298_v33, %s1418_s26 }
 0x788   : > { %v1300_v35 = vpop.eup %1299 }
 0x789   : > { %v600_v36 = vadd.f32 1.0, %v1300_v35 }
 0x78b   : > { %1301 = vrcp.f32 %v600_v36  ;;  %v612_v42 = vand.u32 2147483648, %v600_v36  ;;  %vm606_vm15 = vweird.f32 %v600_v36  ;;  %v610_v43 = vand.u32 2147483647, %v600_v36 }
 0x78d   : > { %v613_v45 = vor.u32 1.1754944e-38, %v612_v42  ;;  %vm611_vm3 = vcmp.eq.f32.partialorder %v610_v43, 8.507059e+37 }
 0x791   : > { %v1302_v37 = vpop.eup %1301 }
 0x792   : > { %v602_v38 = vmul.f32 %v1302_v37, %v600_v36  ;;  %vm607_vm14 = vweird.f32 %v1302_v37 }
 0x793   : > { %vm608_vm2 = vmor %vm606_vm15, %vm607_vm14 }
 0x794   : > { %v603_v39 = vsub.f32 1.0, %v602_v38 }
 0x796   : > { %v604_v40 = vmul.f32 %v1302_v37, %v603_v39 }
 0x798   : > { %v605_v41 = vadd.f32 %v1302_v37, %v604_v40 }
 0x79a   : > { %v609_v44 = vsel %vm608_vm2, %v1302_v37, %v605_v41 }
 0x79b   : > { %v614_v47 = vsel %vm611_vm3, %v613_v45, %v609_v44  ;;  %v1197_v44 = vld [vmem:[%s1075_s18 + $0xc] sm:$0x3]  ;;  %s947_s18 = scalar_lea.sflag [#allocation6], %s1517_s11 }
 0x79c   : > { %v617_v49 = vmul.f32 %v614_v47, %v557_v25 }
 0x7f9   : > { %v620_v46 = vpop.permute.xlu1 %619 }
 0x7fa   : > { %v622_v48 = vmul.f32 %v620_v46, %v614_v47 }
 0x7fc   : > { %624 = vrot.lane.b32.xlu2 %v622_v48, %s1679_s27 }
 0x856   : > { %v625_v50 = vpop.permute.xlu2 %624 }
 0x857   : > { %v627_v51 = vadd.f32 %v625_v50, %v617_v49 }
 0x859   : > { %1303 = vtanh.f32 %v627_v51 }
 0x85f   : > { %v1304_v52 = vpop.eup %1303 }
 0x860   : > { %630 = vrot.lane.b32.xlu0 %v1304_v52, %s1418_s26 }
 0x8d2   : > { %v631_v53 = vpop.permute.xlu0 %630 }
 0x8d3   : > { %v633_v54 = vmul.f32 %v631_v53, %v614_v47 }
 0x8d5   : > { %635 = vrot.lane.b32.xlu1 %v633_v54, %s1679_s27 }
 0x947   : > { %v636_v55 = vpop.permute.xlu1 %635 }
 0x948   : > { %1186 = vst.msk [vmem:[%s1059_s28 + $0x6] sm:$0x3] %vm342_vm0, %v636_v55  ;;  %1188 = vmatmul.msk.f32.vlgmr.msrb.gmra.mxu0 %vm355_vm1, %v636_v55  ;;  %s1678_s28 = smul.u32 4294967282, %s1407_s15 }
 0x94a   : > { %s1083_s29 = scalar_lea.vmem %s1521_s21, %s1678_s28 [#allocation4]  ;;  %s1420_s21 = smov 96  }
 0x9c5   : > { %v663_v57 = vpop.f32.mrf.mxu0 }
 0x9c6   : > { %v666_v58 = vadd.f32 %v663_v57, %v643_v56 }
 0x9c8   : > { %1305 = vtanh.f32 %v666_v58  ;;  %v1189_v60 = vmul.f32 -1.442695, %v666_v58 }
 0x9ca   : > { %1307 = vpow2.f32 %v1189_v60 }
 0x9ce   : > { %v1306_v59 = vpop.eup %1305 }
 0x9cf   : > { %689 = vrot.lane.b32.xlu2 %v1306_v59, %s1418_s26 }
 0x9d0   : > { %v1308_v61 = vpop.eup %1307 }
 0x9d1   : > { %v670_v62 = vadd.f32 1.0, %v1308_v61 }
 0x9d3   : > { %1309 = vrcp.f32 %v670_v62  ;;  %v682_v4 = vand.u32 2147483648, %v670_v62  ;;  %vm676_vm5 = vweird.f32 %v670_v62  ;;  %v680_v5 = vand.u32 2147483647, %v670_v62 }
 0x9d5   : > { %v683_v7 = vor.u32 1.1754944e-38, %v682_v4  ;;  %vm681_vm7 = vcmp.eq.f32.partialorder %v680_v5, 8.507059e+37 }
 0x9d9   : > { %v1310_v63 = vpop.eup %1309 }
 0x9da   : > { %v672_v0 = vmul.f32 %v1310_v63, %v670_v62  ;;  %vm677_vm4 = vweird.f32 %v1310_v63 }
 0x9db   : > { %vm678_vm6 = vmor %vm676_vm5, %vm677_vm4 }
 0x9dc   : > { %v673_v1 = vsub.f32 1.0, %v672_v0 }
 0x9de   : > { %v674_v2 = vmul.f32 %v1310_v63, %v673_v1 }
 0x9e0   : > { %v675_v3 = vadd.f32 %v1310_v63, %v674_v2 }
 0x9e2   : > { %v679_v6 = vsel %vm678_vm6, %v1310_v63, %v675_v3 }
 0x9e3   : > { %v684_v9 = vsel %vm681_vm7, %v683_v7, %v679_v6  ;;  %v1203_v6 = vld [vmem:[%s1083_s29 + $0xe] sm:$0x3] }
 0x9e4   : > { %v687_v11 = vmul.f32 %v684_v9, %v627_v51 }
 0xa29   : > { %v690_v8 = vpop.permute.xlu2 %689 }
 0xa2a   : > { %v692_v10 = vmul.f32 %v690_v8, %v684_v9 }
 0xa2c   : > { %694 = vrot.lane.b32.xlu0 %v692_v10, %s1679_s27 }
 0xa9e   : > { %v695_v12 = vpop.permute.xlu0 %694 }
 0xa9f   : > { %v697_v13 = vadd.f32 %v695_v12, %v687_v11 }
 0xaa1   : > { %1311 = vtanh.f32 %v697_v13 }
 0xaa7   : > { %v1312_v14 = vpop.eup %1311 }
 0xaa8   : > { %700 = vrot.lane.b32.xlu1 %v1312_v14, %s1418_s26 }
 0xb1a   : > { %v701_v15 = vpop.permute.xlu1 %700 }
 0xb1b   : > { %v703_v16 = vmul.f32 %v701_v15, %v684_v9 }
 0xb1d   : > { %705 = vrot.lane.b32.xlu2 %v703_v16, %s1679_s27 }
 0xb77   : > { %v706_v17 = vpop.permute.xlu2 %705 }
 0xb78   : > { %709 = vst.msk [vmem:[%s708_s7] sm:$0x3] %vm342_vm0, %v706_v17  ;;  %1192 = vmatmul.msk.f32.vlgmr.msrb.gmra.mxu1 %vm355_vm1, %v706_v17 }
 0xbf5   : > { %v734_v19 = vpop.f32.mrf.mxu1 }
 0xbf6   : > { %v737_v20 = vadd.f32 %v1191_v18, %v734_v19 }
 0xbf8   : > { %1313 = vtanh.f32 %v737_v20  ;;  %v1193_v22 = vmul.f32 -1.442695, %v737_v20 }
 0xbfa   : > { %1315 = vpow2.f32 %v1193_v22 }
 0xbfe   : > { %v1314_v21 = vpop.eup %1313 }
 0xbff   : > { %760 = vrot.lane.b32.xlu0 %v1314_v21, %s1418_s26 }
 0xc00   : > { %v1316_v23 = vpop.eup %1315 }
 0xc01   : > { %v741_v24 = vadd.f32 1.0, %v1316_v23 }
 0xc03   : > { %1317 = vrcp.f32 %v741_v24  ;;  %v753_v30 = vand.u32 2147483648, %v741_v24  ;;  %vm747_vm9 = vweird.f32 %v741_v24  ;;  %v751_v31 = vand.u32 2147483647, %v741_v24 }
 0xc05   : > { %v754_v33 = vor.u32 1.1754944e-38, %v753_v30  ;;  %vm752_vm11 = vcmp.eq.f32.partialorder %v751_v31, 8.507059e+37 }
 0xc09   : > { %v1318_v25 = vpop.eup %1317 }
 0xc0a   : > { %v743_v26 = vmul.f32 %v1318_v25, %v741_v24  ;;  %vm748_vm8 = vweird.f32 %v1318_v25 }
 0xc0b   : > { %vm749_vm10 = vmor %vm747_vm9, %vm748_vm8 }
 0xc0c   : > { %v744_v27 = vsub.f32 1.0, %v743_v26 }
 0xc0e   : > { %v745_v28 = vmul.f32 %v1318_v25, %v744_v27 }
 0xc10   : > { %v746_v29 = vadd.f32 %v1318_v25, %v745_v28 }
 0xc12   : > { %v750_v32 = vsel %vm749_vm10, %v1318_v25, %v746_v29 }
 0xc13   : > { %v755_v35 = vsel %vm752_vm11, %v754_v33, %v750_v32 }
 0xc14   : > { %v758_v37 = vmul.f32 %v755_v35, %v697_v13 }
 0xc71   : > { %v761_v34 = vpop.permute.xlu0 %760 }
 0xc72   : > { %v763_v36 = vmul.f32 %v761_v34, %v755_v35 }
 0xc74   : > { %765 = vrot.lane.b32.xlu1 %v763_v36, %s1679_s27 }
 0xce6   : > { %v766_v38 = vpop.permute.xlu1 %765 }
 0xce7   : > { %v768_v39 = vadd.f32 %v766_v38, %v758_v37 }
 0xce9   : > { %1319 = vtanh.f32 %v768_v39 }
 0xcef   : > { %v1320_v40 = vpop.eup %1319 }
 0xcf0   : > { %771 = vrot.lane.b32.xlu2 %v1320_v40, %s1418_s26 }
 0xd4a   : > { %v772_v41 = vpop.permute.xlu2 %771 }
 0xd4b   : > { %v774_v42 = vmul.f32 %v772_v41, %v755_v35 }
 0xd4d   : > { %776 = vrot.lane.b32.xlu0 %v774_v42, %s1679_s27 }
 0xdbf   : > { %v777_v43 = vpop.permute.xlu0 %776 }
 0xdc0   : > { %1195 = vst.msk [vmem:[%s1071_s9 + $0xa] sm:$0x3] %vm342_vm0, %v777_v43  ;;  %1198 = vmatmul.msk.f32.vlgmr.msrb.gmra.mxu2 %vm355_vm1, %v777_v43  ;;  %s967_s9 = sshll.u32 %s309_s5, 4  ;;  %s968_s9 = int_to_ptr.vmem [resolvable:$true] %s967_s9 }
 0xe43   : > { %v805_v45 = vpop.f32.mrf.mxu2 }
 0xe44   : > { %v808_v46 = vadd.f32 %v1197_v44, %v805_v45 }
 0xe46   : > { %1321 = vtanh.f32 %v808_v46  ;;  %v1199_v48 = vmul.f32 -1.442695, %v808_v46 }
 0xe48   : > { %1323 = vpow2.f32 %v1199_v48 }
 0xe4c   : > { %v1322_v47 = vpop.eup %1321 }
 0xe4d   : > { %831 = vrot.lane.b32.xlu1 %v1322_v47, %s1418_s26 }
 0xe4e   : > { %v1324_v49 = vpop.eup %1323 }
 0xe4f   : > { %v812_v50 = vadd.f32 1.0, %v1324_v49 }
 0xe51   : > { %1325 = vrcp.f32 %v812_v50  ;;  %v824_v56 = vand.u32 2147483648, %v812_v50  ;;  %vm818_vm13 = vweird.f32 %v812_v50  ;;  %v822_v57 = vand.u32 2147483647, %v812_v50 }
 0xe53   : > { %v825_v59 = vor.u32 1.1754944e-38, %v824_v56  ;;  %vm823_vm15 = vcmp.eq.f32.partialorder %v822_v57, 8.507059e+37 }
 0xe57   : > { %v1326_v51 = vpop.eup %1325 }
 0xe58   : > { %v814_v52 = vmul.f32 %v1326_v51, %v812_v50  ;;  %vm819_vm12 = vweird.f32 %v1326_v51 }
 0xe59   : > { %vm820_vm14 = vmor %vm818_vm13, %vm819_vm12 }
 0xe5a   : > { %v815_v53 = vsub.f32 1.0, %v814_v52 }
 0xe5c   : > { %v816_v54 = vmul.f32 %v1326_v51, %v815_v53 }
 0xe5e   : > { %v817_v55 = vadd.f32 %v1326_v51, %v816_v54 }
 0xe60   : > { %v821_v58 = vsel %vm820_vm14, %v1326_v51, %v817_v55 }
 0xe61   : > { %v826_v61 = vsel %vm823_vm15, %v825_v59, %v821_v58 }
 0xe62   : > { %v829_v63 = vmul.f32 %v826_v61, %v768_v39 }
 0xebf   : > { %v832_v60 = vpop.permute.xlu1 %831 }
 0xec0   : > { %v834_v62 = vmul.f32 %v832_v60, %v826_v61 }
 0xec2   : > { %836 = vrot.lane.b32.xlu2 %v834_v62, %s1679_s27 }
 0xf1c   : > { %v837_v0 = vpop.permute.xlu2 %836 }
 0xf1d   : > { %v839_v1 = vadd.f32 %v837_v0, %v829_v63 }
 0xf1f   : > { %1327 = vtanh.f32 %v839_v1 }
 0xf25   : > { %v1328_v2 = vpop.eup %1327 }
 0xf26   : > { %842 = vrot.lane.b32.xlu0 %v1328_v2, %s1418_s26 }
 0xf98   : > { %v843_v3 = vpop.permute.xlu0 %842 }
 0xf99   : > { %v845_v4 = vmul.f32 %v843_v3, %v826_v61 }
 0xf9b   : > { %847 = vrot.lane.b32.xlu1 %v845_v4, %s1679_s27 }
0x100d   : > { %v848_v5 = vpop.permute.xlu1 %847 }
0x100e   : > { %1201 = vst.msk [vmem:[%s1079_s23 + $0xc] sm:$0x3] %vm342_vm0, %v848_v5  ;;  %1204 = vmatmul.msk.f32.vlgmr.msrb.gmra.mxu3 %vm355_vm1, %v848_v5  ;;  %s1351_s23 = sshra.s32 %s970_s10, 4  ;;  %s1352_s23 = int_to_ptr.hbm [resolvable:$true] %s1351_s23 }
0x100f   : > { %p1358_p4 = scmp.lt.s32.totalorder %s1352_s23, %s1677_s3 }
0x1091   : > { %v876_v7 = vpop.f32.mrf.mxu3 }
0x1092   : > { %v879_v8 = vadd.f32 %v1203_v6, %v876_v7 }
0x1094   : > { %1329 = vtanh.f32 %v879_v8  ;;  %v1205_v10 = vmul.f32 -1.442695, %v879_v8 }
0x1096   : > { %1331 = vpow2.f32 %v1205_v10 }
0x109a   : > { %v1330_v9 = vpop.eup %1329 }
0x109b   : > { %902 = vrot.lane.b32.xlu2 %v1330_v9, %s1418_s26 }
0x109c   : > { %v1332_v11 = vpop.eup %1331 }
0x109d   : > { %v883_v12 = vadd.f32 1.0, %v1332_v11 }
0x109f   : > { %1333 = vrcp.f32 %v883_v12  ;;  %v895_v18 = vand.u32 2147483648, %v883_v12  ;;  %vm889_vm2 = vweird.f32 %v883_v12  ;;  %v893_v19 = vand.u32 2147483647, %v883_v12 }
0x10a1   : > { %v896_v21 = vor.u32 1.1754944e-38, %v895_v18  ;;  %vm894_vm4 = vcmp.eq.f32.partialorder %v893_v19, 8.507059e+37 }
0x10a5   : > { %v1334_v13 = vpop.eup %1333 }
0x10a6   : > { %v885_v14 = vmul.f32 %v1334_v13, %v883_v12  ;;  %vm890_vm1 = vweird.f32 %v1334_v13 }
0x10a7   : > { %vm891_vm3 = vmor %vm889_vm2, %vm890_vm1 }
0x10a8   : > { %v886_v15 = vsub.f32 1.0, %v885_v14 }
0x10aa   : > { %v887_v16 = vmul.f32 %v1334_v13, %v886_v15 }
0x10ac   : > { %v888_v17 = vadd.f32 %v1334_v13, %v887_v16 }
0x10ae   : > { %v892_v20 = vsel %vm891_vm3, %v1334_v13, %v888_v17 }
0x10af   : > { %v897_v23 = vsel %vm894_vm4, %v896_v21, %v892_v20 }
0x10b0   : > { %v900_v25 = vmul.f32 %v897_v23, %v839_v1 }
0x10f5   : > { %v903_v22 = vpop.permute.xlu2 %902 }
0x10f6   : > { %v905_v24 = vmul.f32 %v903_v22, %v897_v23 }
0x10f8   : > { %907 = vrot.lane.b32.xlu0 %v905_v24, %s1679_s27 }
0x116a   : > { %v908_v26 = vpop.permute.xlu0 %907 }
0x116b   : > { %v910_v27 = vadd.f32 %v908_v26, %v900_v25 }
0x116d   : > { %1335 = vtanh.f32 %v910_v27  ;;  %925 = vrot.lane.b32.xlu2 %v910_v27, %s1420_s21 }
0x1173   : > { %v1336_v28 = vpop.eup %1335 }
0x1174   : > { %913 = vrot.lane.b32.xlu1 %v1336_v28, %s1418_s26  ;;  %s1353_s26 = scalar_lea.hbm %s1352_s23, 2 }
0x1175   : > { %p1354_p1 = scmp.ne.s32.totalorder %s1352_s23, %s1353_s26  ;;  %p1359_p6 = scmp.lt.s32.totalorder %s1357_s30, %s1353_s26 }
0x1177   : > { %p1355_p2 = pnand %p1354_p1, %p1480_p5  ;;  %p1360_p7 = por %p1359_p6, %p1358_p4 }
0x1179   : > { %p1356_p3 = pneg %p1355_p2 }
0x117b   : > { %p1361_p8 = pnand %p1360_p7, %p1356_p3 }
0x11c7   : > { %v926_v29 = vpop.permute.xlu2 %925 }
0x11c8   : > { %928 = vst.msk [vmem:[#allocation3] sm:$0x3] %vm342_vm0, %v926_v29 }
0x11c9   : > { %932 = vst.msk [vmem:[%s309_s5] sm:$0x3] %vm342_vm0, %v926_v29 }
0x11ca   : > { %1364 = shalt.err (!%p1361_p8)
}
0x11cb   : > { %1214 = dma.vmem_to_hbm [thread:$0]  (%p1480_p5), %s968_s9, 32, %s970_s10, %s947_s18  }
0x11cc   : > { %s1682_s11 = smov 32   ;;  %s1683_s19 = smul.u32 4294967282, %s1407_s15 }
0x11ce   : > { %s1087_s5 = scalar_lea.vmem %s1535_s4, %s1683_s19 }
0x11e6   : > { %v914_v30 = vpop.permute.xlu1 %913 }
0x11e7   : > { %v916_v31 = vmul.f32 %v914_v30, %v897_v23 }
0x11e9   : > { %918 = vrot.lane.b32.xlu0 %v916_v31, %s1682_s11 }
0x125b   : > { %v919_v32 = vpop.permute.xlu0 %918 }
0x125c   : > { %1207 = vst.msk [vmem:[%s1087_s5 + $0xe] sm:$0x3] %vm342_vm0, %v919_v32 }
0x125d   : > { %923 = vst.msk [vmem:[#allocation2] sm:$0x3] %vm342_vm0, %v919_v32 }
0x125e PF: > { %s997_s27 = sand.u32 1, %s1395_s12   ;;  %p1217_p11 = pnand %p1156_p10, %p1491_p9 }
0x125f   : > { %s998_s22 = scalar_lea.sflag [#allocation6], %s997_s27 }
0x1260   : > { %p1218_p5 = pneg %p1217_p11 }
0x1262   : > { %1390 = dma.done.wait (%p1218_p5), %s998_s22, 32  }
0x1263   : > { %1392 = vsyncadd (%p1218_p5), %s998_s22, 4294967264  ;;  %s17_s17 = sadd.s32 1, %s1415_s17   ;;  %s1684_s12 = smov %s1399_s13 }
0x1264   : > { %p14_p12 = scmp.ge.s32.totalorder %s17_s17, 4   ;;  %s1685_s13 = smov %s1403_s14 }
0x1265   : > { %s1686_s14 = smov %s1489_s24  ;;  %s1687_s15 = smov %s1411_s16 }
0x1266   : > { %s1688_s16 = smov %s1690_s20  ;;  %16 = sbr.rel (!%p14_p12) target bundleno = 4 (0x4), region = 148 }
0x126b   :  { %1004 = vsyncpa [#allocation6], 1 }
0x126c   :  { %1006 = vsyncpa [#allocation6 + $0x1], 1 }

</bundles_post_ra>
